<compile_context>
chip_gen: v7x
topology: tpu7x:2x2x1
jax: 0.10.0
libtpu: 0.0.40
codegen_flags: <defaults>
</compile_context>

<pallas_src>
import numpy as np
import jax
import jax.numpy as jnp
from jax import lax
from jax.experimental import pallas as pl
from jax.experimental.pallas import tpu as pltpu

ROW_TILE = 512            # row tile for the wide (432-lane) submanifold-conv matmuls
ROW_TILE_N = 1024         # row tile for narrow (<=64-lane) elementwise / small-linear kernels
SC_TILE = 256             # point tile for the segmented scatter-mean (review: cap at 256-512)
SC_WIN = SC_TILE + 8      # voxel window per point tile (sorted span <= SC_TILE-1, 8-aligned start)
SC_TPC = 8                # point tiles per voxel chunk (one resident VMEM output block / chunk)
SC_CHUNK_VOX = SC_TPC * SC_TILE + 16   # voxel ids per chunk; bounds resident VMEM to ~1 MiB
VMEM_LIMIT = 32 * 1024 * 1024


def _round_up(x, m):
    return ((x + m - 1) // m) * m


def _pad_rows(x, n_pad):
    n = x.shape[0]
    if n == n_pad:
        return x
    return jnp.concatenate([x, jnp.zeros((n_pad - n,) + x.shape[1:], x.dtype)], axis=0)


def _full_spec(a):
    nd = np.ndim(a)
    return pl.BlockSpec(np.shape(a), lambda *args, _nd=nd: (0,) * _nd)


def _parallel():
    return pltpu.CompilerParams(dimension_semantics=("parallel",),
                                vmem_limit_bytes=VMEM_LIMIT)


# --------------------------- segmented scatter-mean -------------------------

def _scatter_kernel(v0_ref, inv_ref, x_ref, o_ref):
    t = pl.program_id(1)

    @pl.when(t == 0)
    def _():
        o_ref[...] = jnp.zeros_like(o_ref)

    flat = pl.program_id(0) * SC_TPC + t
    v0 = pl.multiple_of(v0_ref[flat], 8)
    seg = v0 + lax.broadcasted_iota(jnp.int32, (SC_WIN, SC_TILE), 0)
    onehot = (seg == inv_ref[...]).astype(jnp.float32)                  # (SC_WIN, SC_TILE)
    contrib = jnp.dot(onehot, x_ref[...], preferred_element_type=jnp.float32)
    o_ref[pl.ds(v0, SC_WIN), :] = o_ref[pl.ds(v0, SC_WIN), :] + contrib


def scatter_mean(x, inv_sorted, num_segments):
    """torch_scatter.scatter_mean(x, inv, dim=0) with rows pre-sorted by dense inv.

    Sorted, dense ids make each SC_TILE point tile touch a contiguous voxel window;
    point tiles are grouped into chunks of SC_TPC tiles so only a (SC_CHUNK_VOX, c+1)
    block is VMEM-resident per chunk (v7x-safe) and the chunk axis is "parallel"
    (megacore).  Sums and counts come out of one (window x tile) one-hot MXU matmul
    (a ones column carries the counts); the division happens after full accumulation.
    """
    n, c = x.shape
    c1 = c + 1
    rows_per_chunk = SC_TPC * SC_TILE
    n_chunks = max(1, -(-n // rows_per_chunk))
    n_pad = n_chunks * rows_per_chunk
    n_tiles = n_chunks * SC_TPC

    xp = jnp.zeros((n_pad, c1), jnp.float32)
    xp = xp.at[:n, :c].set(x.astype(jnp.float32)).at[:n, c].set(1.0)

    inv_np = np.full((n_pad,), -1, np.int64)
    inv_np[:n] = np.asarray(inv_sorted, np.int64)

    first = inv_np[::SC_TILE]
    first = np.where(first < 0, 0, first)
    tile_align = (first // 8) * 8                                  # per-tile window start (absolute)
    base = np.repeat(tile_align[::SC_TPC], SC_TPC)                 # per-tile chunk base (absolute)
    v0 = np.clip(tile_align - base, 0, SC_CHUNK_VOX - SC_WIN).astype(np.int32)

    # window invariant (review correctness note): every id of a tile lies inside its window
    tile_max = inv_np.reshape(n_tiles, SC_TILE).max(axis=1)
    ok = (tile_max < 0) | ((tile_max - base - v0) < SC_WIN)
    assert bool(np.all(ok)), "scatter_mean: sorted-window invariant violated"

    inv_rel = np.where(inv_np >= 0, inv_np - np.repeat(base, SC_TILE), -1).astype(np.int32)

    out = pl.pallas_call(
        _scatter_kernel,
        grid_spec=pltpu.PrefetchScalarGridSpec(
            num_scalar_prefetch=1,
            grid=(n_chunks, SC_TPC),
            in_specs=[pl.BlockSpec((1, SC_TILE), lambda ci, t, v0r: (0, ci * SC_TPC + t)),
                      pl.BlockSpec((SC_TILE, c1), lambda ci, t, v0r: (ci * SC_TPC + t, 0))],
            out_specs=pl.BlockSpec((SC_CHUNK_VOX, c1), lambda ci, t, v0r: (ci, 0)),
        ),
        out_shape=jax.ShapeDtypeStruct((n_chunks * SC_CHUNK_VOX, c1), jnp.float32),
        compiler_params=pltpu.CompilerParams(
            dimension_semantics=("parallel", "arbitrary"),
            vmem_limit_bytes=VMEM_LIMIT),
    )(jnp.asarray(v0), jnp.asarray(inv_rel.reshape(1, n_pad)), xp)

    # combine per-chunk windows (chunk ranges may overlap at a shared boundary voxel -> add)
    chunk_bases = tile_align[::SC_TPC]
    total = jnp.zeros((num_segments + SC_CHUNK_VOX, c1), jnp.float32)
    for ci in range(n_chunks):
        b = int(chunk_bases[ci])
        total = total.at[b:b + SC_CHUNK_VOX].add(out[ci * SC_CHUNK_VOX:(ci + 1) * SC_CHUNK_VOX])

    sums = total[:num_segments, :c]
    counts = jnp.maximum(total[:num_segments, c:], 1.0)
    return sums / counts


# --------------------------------- PPmodel ----------------------------------

def _ppmodel_kernel(x_ref, w1_ref, b1_ref, g_ref, be_ref, w2_ref, b2_ref, o_ref):
    h = jnp.dot(x_ref[...], w1_ref[...], preferred_element_type=jnp.float32) + b1_ref[...]
    mu = jnp.mean(h, axis=-1, keepdims=True)
    var = jnp.mean((h - mu) ** 2, axis=-1, keepdims=True)
    h = (h - mu) * lax.rsqrt(var + 1e-5) * g_ref[...] + be_ref[...]
    h = jnp.maximum(h, 0.0)
    o_ref[...] = jnp.dot(h, w2_ref[...], preferred_element_type=jnp.float32) + b2_ref[...]


def ppmodel(x_pad, p):
    """Linear(9,16) -> LayerNorm(16) -> ReLU -> Linear(16,16), tiled over 1024-row tiles."""
    n = x_pad.shape[0]
    t = n // ROW_TILE_N
    weights = [p['pp_w1'], p['pp_b1'].reshape(1, 16),
               p['pp_ln_g'].reshape(1, 16), p['pp_ln_b'].reshape(1, 16),
               p['pp_w2'], p['pp_b2'].reshape(1, 16)]
    return pl.pallas_call(
        _ppmodel_kernel,
        grid=(t,),
        in_specs=[pl.BlockSpec((ROW_TILE_N, 9), lambda i: (i, 0))] + [_full_spec(w) for w in weights],
        out_specs=pl.BlockSpec((ROW_TILE_N, 16), lambda i: (i, 0)),
        out_shape=jax.ShapeDtypeStruct((n, 16), jnp.float32),
        compiler_params=_parallel(),
    )(x_pad.astype(jnp.float32), *weights)


# --------------------------- generic tiled linear ----------------------------

def _make_linear_kernel(act):
    def kernel(x_ref, w_ref, b_ref, o_ref):
        y = jnp.dot(x_ref[...], w_ref[...], preferred_element_type=jnp.float32) + b_ref[...]
        if act == 'relu':
            y = jnp.maximum(y, 0.0)
        o_ref[...] = y
    return kernel


def linear_act(x, w, b, act='none'):
    n, cin = x.shape
    cout = w.shape[1]
    t = n // ROW_TILE_N
    w = jnp.asarray(w, jnp.float32)
    b = jnp.asarray(b, jnp.float32).reshape(1, cout)
    return pl.pallas_call(
        _make_linear_kernel(act),
        grid=(t,),
        in_specs=[pl.BlockSpec((ROW_TILE_N, cin), lambda i: (i, 0)), _full_spec(w), _full_spec(b)],
        out_specs=pl.BlockSpec((ROW_TILE_N, cout), lambda i: (i, 0)),
        out_shape=jax.ShapeDtypeStruct((n, cout), jnp.float32),
        compiler_params=_parallel(),
    )(x.astype(jnp.float32), w, b)


# --------------------- SubMConv3d blocks (SFE BasicBlock) --------------------

def _conv_kernel(g_ref, w_ref, y_ref, st_ref):
    # one MXU matmul per tile (identity 1x1 conv is folded into the 3x3 weight for
    # stage A) plus lane-packed per-tile BN partial sums [sum | sumsq] (two-pass BN).
    y = jnp.dot(g_ref[...], w_ref[...], preferred_element_type=jnp.float32)
    y_ref[...] = y
    s = jnp.sum(y, axis=0, keepdims=True)
    sq = jnp.sum(y * y, axis=0, keepdims=True)
    stats = jnp.concatenate([s, sq], axis=1)
    st_ref[...] = jnp.concatenate([stats, jnp.zeros((7, stats.shape[1]), jnp.float32)], axis=0)


def conv_matmul(g_bf16, w_bf16):
    m_pad, kd = g_bf16.shape
    cout = w_bf16.shape[1]
    t = m_pad // ROW_TILE
    # TODO(synk): if xprof shows exposed DMA on this wide gathered stream (esp. v6e),
    # add pipeline_mode=pl.Buffered(3) to the g BlockSpec.
    return pl.pallas_call(
        _conv_kernel,
        grid=(t,),
        in_specs=[pl.BlockSpec((ROW_TILE, kd), lambda i: (i, 0)), _full_spec(w_bf16)],
        out_specs=[pl.BlockSpec((ROW_TILE, cout), lambda i: (i, 0)),
                   pl.BlockSpec((8, 2 * cout), lambda i: (i, 0))],
        out_shape=[jax.ShapeDtypeStruct((m_pad, cout), jnp.float32),
                   jax.ShapeDtypeStruct((8 * t, 2 * cout), jnp.float32)],
        compiler_params=_parallel(),
    )(g_bf16, w_bf16)


def _bn_from_sums(s, sq, m_valid, gamma, beta, eps=1e-5):
    """Training-mode BatchNorm1d affine from global (sum, sumsq) over the valid rows."""
    mean = s / m_valid
    var = jnp.maximum(sq / m_valid - mean * mean, 0.0)
    inv = lax.rsqrt(var + eps)
    scale = jnp.asarray(gamma, jnp.float32) * inv
    shift = jnp.asarray(beta, jnp.float32) - mean * scale
    return scale.reshape(1, -1), shift.reshape(1, -1)


def _make_block_out_kernel(m_valid, tile):
    # fused finalize: identity-BN + branch-BN + residual add + LeakyReLU(0.1), padded rows zeroed
    def kernel(ya_ref, yb_ref, sc_ref, sh_ref, o_ref):
        i = pl.program_id(0)
        ya = ya_ref[...]
        sc = sc_ref[...]
        sh = sh_ref[...]
        ident = ya[:, 16:32] * sc[:, :16] + sh[:, :16]
        outb = yb_ref[...] * sc[:, 16:32] + sh[:, 16:32]
        z = ident + outb
        z = jnp.where(z >= 0.0, z, 0.1 * z)
        rows = i * tile + lax.broadcasted_iota(jnp.int32, (tile, 1), 0)
        o_ref[...] = jnp.where(rows < m_valid, z, 0.0)
    return kernel


def build_neighbor_table(coords_np, spatial_shape, batch_size, m_pad):
    """(M_pad, 27) neighbor voxel ids for SubMConv3d(k=3); missing / padded -> m_pad (zero row)."""
    # TODO(synk): cache this rulebook across forwards (spconv indice_dict equivalent).
    m = coords_np.shape[0]
    X, Y, Z = spatial_shape
    lut = np.full((batch_size, X, Y, Z), -1, np.int32)
    b, x, y, z = coords_np[:, 0], coords_np[:, 1], coords_np[:, 2], coords_np[:, 3]
    lut[b, x, y, z] = np.arange(m, dtype=np.int32)
    nbr = np.full((m_pad, 27), m_pad, np.int32)
    k = 0
    for dx in (-1, 0, 1):
        for dy in (-1, 0, 1):
            for dz in (-1, 0, 1):
                nx, ny, nz = x + dx, y + dy, z + dz
                valid = (nx >= 0) & (nx < X) & (ny >= 0) & (ny < Y) & (nz >= 0) & (nz < Z)
                idx = lut[b, np.clip(nx, 0, X - 1), np.clip(ny, 0, Y - 1), np.clip(nz, 0, Z - 1)]
                nbr[:m, k] = np.where(valid & (idx >= 0), idx, m_pad)
                k += 1
    return jnp.asarray(nbr)


def basic_block(feats, nbr_idx, bp, m_valid):
    """spconv BasicBlock: identity(1x1x1+BN) + (3x3x3+BN+LReLU(0.1)+3x3x3+BN) + residual, LReLU(0.1)."""
    m_pad, c = feats.shape
    tc = m_pad // ROW_TILE
    tn = m_pad // ROW_TILE_N

    def gather27(f):
        # TODO(synk): still an XLA row gather that materializes (m_pad, 27*c) in HBM; an
        # in-kernel DMA/one-hot gather with feats resident in VMEM is the remaining follow-up.
        f_ext = jnp.concatenate([f, jnp.zeros((1, c), f.dtype)], axis=0)
        return f_ext[nbr_idx].reshape(m_pad, 27 * c).astype(jnp.bfloat16)

    # fold the 1x1 identity conv into the 3x3 weight: cols 0:16 = 3x3 branch,
    # cols 16:32 = identity (w_in placed at the center-tap rows 13*16:14*16).
    w_a = jnp.asarray(bp['w_a'], jnp.float32).reshape(27 * c, c)
    w_in_col = jnp.zeros((27 * c, c), jnp.float32).at[13 * c:14 * c, :].set(
        jnp.asarray(bp['w_in'], jnp.float32))
    w_comb = jnp.concatenate([w_a, w_in_col], axis=1).astype(jnp.bfloat16)       # (432, 32)
    w_b = jnp.asarray(bp['w_b'], jnp.float32).reshape(27 * c, c).astype(jnp.bfloat16)

    # stage A: combined 3x3 + identity conv (one matmul), per-tile BN partial sums ride along
    g1 = gather27(feats)
    ya, st_a = conv_matmul(g1, w_comb)                                # ya = [branch_a | identity]
    ra = jnp.sum(st_a.reshape(tc, 8, 64)[:, 0, :], axis=0)
    sc_a, sh_a = _bn_from_sums(ra[0:16], ra[32:48], m_valid, bp['bn_a_g'], bp['bn_a_b'])
    sc_in, sh_in = _bn_from_sums(ra[16:32], ra[48:64], m_valid, bp['bn_in_g'], bp['bn_in_b'])

    # BN_a + LeakyReLU applied in XLA just before the second gather (commutes with the
    # row gather); no standalone BN-apply Pallas kernel / HBM round-trip anymore.
    h = ya[:, :16] * sc_a + sh_a
    h = jnp.where(h >= 0.0, h, 0.1 * h)

    # stage B: second 3x3 conv
    g2 = gather27(h)
    yb, st_b = conv_matmul(g2, w_b)
    rb = jnp.sum(st_b.reshape(tc, 8, 32)[:, 0, :], axis=0)
    sc_b, sh_b = _bn_from_sums(rb[:16], rb[16:], m_valid, bp['bn_b_g'], bp['bn_b_b'])

    sc = jnp.concatenate([sc_in, sc_b], axis=1)
    sh = jnp.concatenate([sh_in, sh_b], axis=1)

    # stage C: fused BN + residual + LeakyReLU finalize
    out = pl.pallas_call(
        _make_block_out_kernel(m_valid, ROW_TILE_N),
        grid=(tn,),
        in_specs=[pl.BlockSpec((ROW_TILE_N, 32), lambda i: (i, 0)),
                  pl.BlockSpec((ROW_TILE_N, 16), lambda i: (i, 0)),
                  _full_spec(sc), _full_spec(sh)],
        out_specs=pl.BlockSpec((ROW_TILE_N, 16), lambda i: (i, 0)),
        out_shape=jax.ShapeDtypeStruct((m_pad, 16), jnp.float32),
        compiler_params=_parallel(),
    )(ya, yb, sc, sh)
    return out


# ----------------------------------- SGFE ------------------------------------

def _sgfe_tail_kernel(red_ref, fg_ref, wbd_ref, bfc_ref, wfcw_ref, wfcs_ref, bfcs_ref,
                      wout_ref, wlo1_ref, wlo2_ref, blo2_ref, o_ref):
    red = red_ref[...]
    att = jnp.dot(fg_ref[...], wbd_ref[...], preferred_element_type=jnp.float32) + bfc_ref[...]
    att = jnp.maximum(att, 0.0)                                         # (tile, 32) = 4 scales x 8
    feat_s = att[:, 0:8] + att[:, 8:16] + att[:, 16:24] + att[:, 24:32]
    feat_z = jnp.maximum(jnp.dot(feat_s, wfcw_ref[...], preferred_element_type=jnp.float32), 0.0)
    av = jax.nn.sigmoid(jnp.dot(feat_z, wfcs_ref[...], preferred_element_type=jnp.float32)
                        + bfcs_ref[...])
    pooled = (att[:, 0:8] * av[:, 0:8] + att[:, 8:16] * av[:, 8:16]
              + att[:, 16:24] * av[:, 16:24] + att[:, 24:32] * av[:, 24:32])
    scale_out = jnp.dot(pooled, wout_ref[...], preferred_element_type=jnp.float32)
    out_f = jnp.concatenate([red, scale_out], axis=1)                   # (tile, 32)
    h = jnp.maximum(jnp.dot(out_f, wlo1_ref[...], preferred_element_type=jnp.float32), 0.0)
    proj = jnp.dot(h, wlo2_ref[...], preferred_element_type=jnp.float32) + blo2_ref[...]
    o_ref[...] = jax.nn.sigmoid(proj)                                   # SoftModel's feature sigmoid


def build_scale_meta(unq):
    """Host-side per-pooling-scale unique/argsort metadata, hoisted ahead of all device work."""
    orders, inv_sorted, inv_orig, sizes = [], [], [], []
    for ps in (2, 4, 6, 8):
        idx = np.concatenate([unq[:, :1], unq[:, 1:] // ps], axis=1)
        _, inv = np.unique(idx, axis=0, return_inverse=True)
        inv = inv.reshape(-1).astype(np.int64)
        order = np.argsort(inv, kind='stable')
        orders.append(order)
        inv_orig.append(inv)
        inv_sorted.append(inv[order])
        sizes.append(int(inv.max()) + 1)
    offs = np.concatenate([[0], np.cumsum(sizes)]).astype(np.int64)
    return dict(orders=orders, inv_sorted=inv_sorted, inv_orig=inv_orig, sizes=sizes, offs=offs)


def sgfe(feats, scale_meta, m_valid, p):
    m_pad = feats.shape[0]
    t = m_pad // ROW_TILE_N

    reduced = linear_act(feats, p['fr_w'], p['fr_b'], act='relu')        # (m_pad, 16)
    reduced_valid = reduced[:m_valid]

    # all four per-scale scatter-means merged into ONE segmented scatter call:
    # per-scale sorted rows concatenated, voxel ids offset into disjoint dense ranges.
    offs = scale_meta['offs']
    rows = jnp.concatenate([reduced_valid[jnp.asarray(o)] for o in scale_meta['orders']], axis=0)
    inv_cat = np.concatenate([scale_meta['inv_sorted'][j] + offs[j] for j in range(4)])
    fkm_all = scatter_mean(rows, inv_cat, int(offs[4]))                  # (sum M_s, 16)

    gathered = [fkm_all[jnp.asarray(scale_meta['inv_orig'][j] + offs[j])] for j in range(4)]
    fkm_g = _pad_rows(jnp.concatenate(gathered, axis=1), m_pad)          # (m_pad, 64)

    # pack per-scale weights: 4x Linear(16,8) -> block-diagonal (64,32); 4x Linear(8,8) -> (8,32)
    wbd = np.zeros((64, 32), np.float32)
    bfc = np.zeros((1, 32), np.float32)
    for j, (w, b) in enumerate(p['fc_list']):
        wbd[j * 16:(j + 1) * 16, j * 8:(j + 1) * 8] = np.asarray(w)
        bfc[0, j * 8:(j + 1) * 8] = np.asarray(b)
    wfcs = np.concatenate([np.asarray(w) for (w, _) in p['fcs']], axis=1)
    bfcs = np.concatenate([np.asarray(b).reshape(1, 8) for (_, b) in p['fcs']], axis=1)

    args = [reduced, fkm_g,
            jnp.asarray(wbd), jnp.asarray(bfc),
            jnp.asarray(p['fc_w'], jnp.float32), jnp.asarray(wfcs), jnp.asarray(bfcs),
            jnp.asarray(p['out_fc_w'], jnp.float32), jnp.asarray(p['lo_w1'], jnp.float32),
            jnp.asarray(p['lo_w2'], jnp.float32), jnp.asarray(p['lo_b2'], jnp.float32).reshape(1, 1)]
    in_specs = [pl.BlockSpec((ROW_TILE_N, 16), lambda i: (i, 0)),
                pl.BlockSpec((ROW_TILE_N, 64), lambda i: (i, 0))] + [_full_spec(a) for a in args[2:]]

    proj = pl.pallas_call(
        _sgfe_tail_kernel,
        grid=(t,),
        in_specs=in_specs,
        out_specs=pl.BlockSpec((ROW_TILE_N, 1), lambda i: (i, 0)),
        out_shape=jax.ShapeDtypeStruct((m_pad, 1), jnp.float32),
        compiler_params=_parallel(),
    )(*args)
    return proj


# ------------------------------- parameters ----------------------------------

def init_params(key):
    ks = iter(jax.random.split(key, 32))

    def W(shape, scale=0.1):
        return scale * jax.random.normal(next(ks), shape, jnp.float32)

    p = {}
    # PPmodel
    p['pp_w1'] = W((9, 16)); p['pp_b1'] = jnp.zeros((16,), jnp.float32)
    p['pp_ln_g'] = jnp.ones((16,), jnp.float32); p['pp_ln_b'] = jnp.zeros((16,), jnp.float32)
    p['pp_w2'] = W((16, 16)); p['pp_b2'] = jnp.zeros((16,), jnp.float32)
    # SFE: two BasicBlocks (C=16)
    p['sfe'] = []
    for _ in range(2):
        p['sfe'].append(dict(
            w_in=W((16, 16)),
            bn_in_g=jnp.ones((16,), jnp.float32), bn_in_b=jnp.zeros((16,), jnp.float32),
            w_a=W((27, 16, 16), 0.05),
            bn_a_g=jnp.ones((16,), jnp.float32), bn_a_b=jnp.zeros((16,), jnp.float32),
            w_b=W((27, 16, 16), 0.05),
            bn_b_g=jnp.ones((16,), jnp.float32), bn_b_b=jnp.zeros((16,), jnp.float32),
        ))
    # SGFE (input=16, reduce=16, out=1)
    p['fr_w'] = W((16, 16)); p['fr_b'] = jnp.zeros((16,), jnp.float32)
    p['fc_list'] = [(W((16, 8)), jnp.zeros((8,), jnp.float32)) for _ in range(4)]
    p['fcs'] = [(W((8, 8)), jnp.zeros((8,), jnp.float32)) for _ in range(4)]
    p['fc_w'] = W((8, 8))
    p['out_fc_w'] = W((8, 16))
    p['lo_w1'] = W((32, 16))
    p['lo_w2'] = W((16, 1)); p['lo_b2'] = jnp.zeros((1,), jnp.float32)
    return p


# ------------------------------- forward pass --------------------------------

def voxelization_forward(pc, batch_idx, params, coors_range_xyz, spatial_shape, key):
    # ---- host preamble: ALL dynamic-shape / unique / argsort / table work up front ----
    pc_np = np.asarray(pc, np.float32)
    bi_np = np.asarray(batch_idx, np.int64)
    lo = np.array([r[0] for r in coors_range_xyz], np.float32)
    hi = np.array([r[1] for r in coors_range_xyz], np.float32)
    ss = np.asarray(spatial_shape, np.int64)

    # filter_pc (dynamic shape -> host glue)
    mask = np.all((pc_np > lo + 1e-4) & (pc_np < hi - 1e-4), axis=1)
    fpc = pc_np[mask]
    fbi = bi_np[mask]
    if fpc.shape[0] < 10:
        fpc = np.asarray(jax.random.uniform(key, (10, 3), jnp.float32))
        fbi = np.zeros((10,), np.int64)

    # sparse_quantize + unique
    xidx = (ss[0] * (fpc[:, 0] - lo[0]) / (hi[0] - lo[0])).astype(np.int64)
    yidx = (ss[1] * (fpc[:, 1] - lo[1]) / (hi[1] - lo[1])).astype(np.int64)
    zidx = (ss[2] * (fpc[:, 2] - lo[2]) / (hi[2] - lo[2])).astype(np.int64)
    bxyz = np.stack([fbi, xidx, yidx, zidx], axis=-1)
    unq, unq_inv = np.unique(bxyz, axis=0, return_inverse=True)
    unq_inv = unq_inv.reshape(-1)
    M = unq.shape[0]

    # sort points once by voxel id -> all point-level scatters become segmented reductions
    order = np.argsort(unq_inv, kind='stable')
    fpc = fpc[order]
    unq_inv = unq_inv[order]
    bxyz = bxyz[order]
    N = fpc.shape[0]

    n_pad = _round_up(N, ROW_TILE_N)
    m_pad = _round_up(M, ROW_TILE_N)
    batch_size = int(bxyz[:, 0].max()) + 1
    sshape = tuple(int(s) for s in ss)

    nbr_idx = build_neighbor_table(unq.astype(np.int64), sshape, batch_size, m_pad)
    scale_meta = build_scale_meta(unq.astype(np.int64))

    # ---------------------------------- device ----------------------------------
    point = jnp.asarray(fpc, jnp.float32)
    inv_j = jnp.asarray(unq_inv.astype(np.int32))

    # prepare_input (scatter_mean in Pallas)
    pc_mean = scatter_mean(point, unq_inv, M)                            # (M, 3)
    nor_pc = point - pc_mean[inv_j]
    intervals = jnp.asarray((hi - lo) / ss, jnp.float32)
    voxel_centers = jnp.asarray(bxyz[:, 1:], jnp.float32) * intervals + jnp.asarray(lo, jnp.float32)
    center_to_point = point - voxel_centers
    pc_feature = jnp.concatenate([point, nor_pc, center_to_point], axis=1)   # (N, 9)

    # PPmodel + per-voxel mean pooling
    pt_fea = ppmodel(_pad_rows(pc_feature, n_pad), params)[:N]
    features = scatter_mean(pt_fea, unq_inv, M)                          # (M, 16)
    feats = _pad_rows(features, m_pad)

    # SoftModel: SFE (2 BasicBlocks of submanifold convs) -> SGFE -> sigmoid -> dense
    # TODO(synk): BatchNorm running-stat updates (training-mode batch stats are used here).
    for blk in params['sfe']:
        feats = basic_block(feats, nbr_idx, blk, M)
    proj = sgfe(feats, scale_meta, M, params)[:M]                        # (M, 1)

    coords = jnp.asarray(unq.astype(np.int32))
    X, Y, Z = sshape
    dense = jnp.zeros((batch_size, X, Y, Z, 1), jnp.float32)
    dense = dense.at[coords[:, 0], coords[:, 1], coords[:, 2], coords[:, 3], :].set(proj)
    dense = jnp.transpose(dense, (0, 4, 1, 2, 3))                        # (B, C, X, Y, Z)
    return jnp.squeeze(dense, axis=1)                                    # (B, X, Y, Z)


# ----------------------------------- main -------------------------------------

if __name__ == "__main__":
    key = jax.random.PRNGKey(0)
    k_pc, k_bi, k_param, k_fb = jax.random.split(key, 4)

    coors_range_xyz = [[-10.0, 10.0], [-10.0, 10.0], [-2.0, 6.0]]
    spatial_shape = [8, 8, 8]
    N = 64

    lo = jnp.array([r[0] for r in coors_range_xyz], jnp.float32)
    hi = jnp.array([r[1] for r in coors_range_xyz], jnp.float32)
    # a few points fall slightly outside the range to exercise filter_pc
    pc = jax.random.uniform(k_pc, (N, 3), jnp.float32, minval=lo - 1.0, maxval=hi + 1.0)
    batch_idx = jax.random.randint(k_bi, (N,), 0, 2, jnp.int32)

    params = init_params(k_param)
    out = voxelization_forward(pc, batch_idx, params, coors_range_xyz, spatial_shape, k_fb)
    out = jax.block_until_ready(out)
    assert out.ndim == 4 and out.shape[1:] == (8, 8, 8)
    print("KERNEL_OK")
</pallas_src>

<mosaic_0001>
module attributes {stable_mosaic.version = 11 : i64} {
  func.func @_scatter_kernel(%arg0: i32, %arg1: i32, %arg2: memref<8xi32, #tpu.memory_space<smem>>, %arg3: memref<1x256xi32, #tpu.memory_space<vmem>>, %arg4: memref<256x4xf32, #tpu.memory_space<vmem>>, %arg5: memref<2064x4xf32, #tpu.memory_space<vmem>>) attributes {dimension_semantics = [#tpu.dimension_semantics<parallel>, #tpu.dimension_semantics<arbitrary>], iteration_bounds = array<i64: 1, 8>, scalar_prefetch = 1 : i64, scratch_operands = 0 : i64, tpu.core_type = #tpu.core_type<tc>, window_params = [{transform_indices = @transform_0, window_bounds = array<i64: 1, 256>}, {transform_indices = @transform_1, window_bounds = array<i64: 256, 4>}, {transform_indices = @transform_2, window_bounds = array<i64: 2064, 4>}]} {
    %c0_i32 = arith.constant 0 : i32
    %0 = arith.cmpi eq, %arg1, %c0_i32 : i32
    %1 = arith.extui %0 : i1 to i32
    %c0_i32_0 = arith.constant 0 : i32
    %2 = arith.cmpi ne, %1, %c0_i32_0 : i32
    scf.if %2 {
      %cst_6 = arith.constant 0.000000e+00 : f32
      %23 = vector.broadcast %cst_6 : f32 to vector<2064x4xf32>
      %c0_7 = arith.constant 0 : index
      %c0_8 = arith.constant 0 : index
      %24 = vector.load %arg5[%c0_7, %c0_8] : memref<2064x4xf32, #tpu.memory_space<vmem>>, vector<2064x4xf32>
      tpu.vector_store %arg5[%c0_7, %c0_8], %23 {strides = array<i32>} : memref<2064x4xf32, #tpu.memory_space<vmem>>, vector<2064x4xf32>,
    } else {
    }
    %c8_i32 = arith.constant 8 : i32
    %3 = arith.muli %arg0, %c8_i32 : i32
    %4 = arith.addi %3, %arg1 : i32
    %5 = arith.index_cast %4 : i32 to index
    %6 = memref.load %arg2[%5] : memref<8xi32, #tpu.memory_space<smem>>
    %7 = tpu.assume_multiple %6, 8 : i32
    %8 = tpu.iota {dimensions = array<i32: 0>} : vector<264x256xi32>
    %9 = vector.broadcast %7 : i32 to vector<264x256xi32>
    %10 = arith.addi %9, %8 : vector<264x256xi32>
    %c0 = arith.constant 0 : index
    %c0_1 = arith.constant 0 : index
    %11 = vector.load %arg3[%c0, %c0_1] : memref<1x256xi32, #tpu.memory_space<vmem>>, vector<1x256xi32>
    %12 = vector.broadcast %11 : vector<1x256xi32> to vector<264x256xi32>
    %13 = arith.cmpi eq, %10, %12 : vector<264x256xi32>
    %14 = arith.extui %13 : vector<264x256xi1> to vector<264x256xi32>
    %15 = arith.sitofp %14 : vector<264x256xi32> to vector<264x256xf32>
    %c0_2 = arith.constant 0 : index
    %c0_3 = arith.constant 0 : index
    %16 = vector.load %arg4[%c0_2, %c0_3] : memref<256x4xf32, #tpu.memory_space<vmem>>, vector<256x4xf32>
    %cst = arith.constant dense<0.000000e+00> : vector<264x4xf32>
    %17 = tpu.matmul %15, %16, %cst {dimension_numbers = #tpu.dot_dimension_numbers<[1], [0], [0], [1], [0, 0, 1, 1], [], []>} : vector<264x256xf32>, vector<256x4xf32>, vector<264x4xf32> -> vector<264x4xf32>
    %18 = arith.index_cast %7 : i32 to index
    %c0_4 = arith.constant 0 : index
    %19 = vector.load %arg5[%18, %c0_4] : memref<2064x4xf32, #tpu.memory_space<vmem>>, vector<264x4xf32>
    %20 = arith.addf %19, %17 : vector<264x4xf32>
    %21 = arith.index_cast %7 : i32 to index
    %c0_5 = arith.constant 0 : index
    %22 = vector.load %arg5[%21, %c0_5] : memref<2064x4xf32, #tpu.memory_space<vmem>>, vector<264x4xf32>
    tpu.vector_store %arg5[%21, %c0_5], %20 {strides = array<i32>} : memref<2064x4xf32, #tpu.memory_space<vmem>>, vector<264x4xf32>,
    return
  }
  func.func @transform_0(%arg0: i32, %arg1: i32, %arg2: memref<8xi32, #tpu.memory_space<smem>>) -> (i32, i32) {
    %c8_i32 = arith.constant 8 : i32
    %0 = arith.muli %arg0, %c8_i32 : i32
    %1 = arith.addi %0, %arg1 : i32
    %c0_i32 = arith.constant 0 : i32
    %c0_i32_0 = arith.constant 0 : i32
    return %c0_i32, %1 : i32, i32
  }
  func.func @transform_1(%arg0: i32, %arg1: i32, %arg2: memref<8xi32, #tpu.memory_space<smem>>) -> (i32, i32) {
    %c8_i32 = arith.constant 8 : i32
    %0 = arith.muli %arg0, %c8_i32 : i32
    %1 = arith.addi %0, %arg1 : i32
    %c0_i32 = arith.constant 0 : i32
    %c0_i32_0 = arith.constant 0 : i32
    return %1, %c0_i32 : i32, i32
  }
  func.func @transform_2(%arg0: i32, %arg1: i32, %arg2: memref<8xi32, #tpu.memory_space<smem>>) -> (i32, i32) {
    %c0_i32 = arith.constant 0 : i32
    %c0_i32_0 = arith.constant 0 : i32
    return %arg0, %c0_i32 : i32, i32
  }
}

</mosaic_0001>

<bundles_post_ra>
// kernel: tpu_custom_call.1
= control target key start
LH: loop header
LB: loop body
LE: loop exit
PB: predicated region body
PF: predicated region fallthrough
CT: control target
= control target key end

     0   :  { %s3415_s0 = inlined_call_operand.vmem [shape: s32[8], index: 0, kind: input, shape index: {}]   ;;  %s3416_s1 = inlined_call_operand.vmem [shape: s32[1,2048], index: 1, kind: input, shape index: {}]   ;;  %s3417_s2 = inlined_call_operand.vmem [shape: f32[2048,4], index: 2, kind: input, shape index: {}]   ;;  %s3418_s3 = inlined_call_operand.vmem [shape: f32[2064,4], index: 3, kind: output, shape index: {}]  }
   0x1   :  { %s8_s14 = sshll.u32 %s3415_s0, 4  ;;  %s9_s14 = int_to_ptr.vmem [resolvable:$true] %s8_s14 }
   0x2   :  { %s1441_s15 = scalar_lea.vmem %s9_s14, 16  ;;  %p1446_p1 = scmp.lt.s32.totalorder %s9_s14, %s9_s14 }
   0x3   :  { %p1442_p0 = scmp.ne.s32.totalorder %s9_s14, %s1441_s15  ;;  %p1447_p2 = scmp.lt.s32.totalorder %s1441_s15, %s1441_s15 }
   0x5   :  { %p1448_p3 = por %p1447_p2, %p1446_p1 }
   0x7   :  { %p1449_p4 = pnand %p1448_p3, %p1442_p0 }
   0x9   :  { %1452 = shalt.err (!%p1449_p4)  }
   0xa   :  { %s1479_s16 = smov [#allocation3]  }
   0xb   :  { %11 = dma.vmem_to_smem %s9_s14, 16, %s1479_s16, [#allocation2] }
   0xc   :  { %1465 = dma.done.wait [#allocation2], 16 }
   0xd   :  { %1466 = vsyncadd [#allocation2], 4294967280 }
   0xe   :  { %13 = sfence }
   0xf   :  { %s1506_s17 = smov 0   ;;  %s1508_s18 = smov 0  }
  0x10   :  { %s1510_s19 = smov 0  }
  0x11 LB: > { %s28_s0 = sadd.s32 1, %s1473_s18  ;;  %p1192_p5 = scmp.ge.s32.totalorder %s1477_s19, 1  ;;  %s1477_s19 = sphi %s1510_s19, %s19_s19   ;;  %s1473_s18 = sphi %s1508_s18, %s3438_s18   ;;  %s1469_s17 = sphi %s1506_s17, %s3437_s17  }
  0x12   : > { %p29_p6 = scmp.ge.s32.totalorder %s28_s0, 8  ;;  %p158_p7 = scmp.lt.s32.totalorder %s1477_s19, 9 }
  0x14   : > { %s3440_s0 = smov (%p29_p6, %s28_s0), 0  ;;  %p159_p8 = pnand %p1192_p5, %p158_p7 }
  0x15   : > { %s1193_s20 = sshll.u32 (!%p159_p8), %s1469_s17, 1  ;;  %s1194_s21 = sshll.u32 (!%p159_p8), %s1469_s17, 5 }
  0x16   : > { %162 = sbr.rel (%p159_p8) target bundleno = 505 (0x1f9), region = 28  ;;  %p191_p9 = scmp.lt.s32.totalorder (!%p159_p8), %s1193_s20, 15 }
  0x17   : > { %p200_p10 = scmp.lt.s32.totalorder (!%p159_p8), %s1194_s21, 255  ;;  %p1196_p11 = scmp.ne.s32.totalorder (!%p159_p8), %s1469_s17, 0 }
  0x1d   : > { %s3442_s20 = smov (!%p191_p9, %s1193_s20), 15  ;;  %s3444_s21 = smov (!%p200_p10, %s1194_s21), 255 }
  0x1e   : > { %s193_s24 = scalar_lea.vmem %s3416_s1, %s3442_s20  ;;  %s1195_s25 = sshll.u32 %s3444_s21, 3  ;;  %vm217_vm0 = vcmask (!%p1196_p11), 31744   ;;  %v1480_v0 = vmov (!%p1196_p11), 0.0  }
  0x1f   : > { %s1537_s28 = scalar_lea.vmem %s3417_s2, %s1195_s25  ;;  %216 = sbr.rel (%p1196_p11) target bundleno = 160 (0xa0), region = 32  ;;  %218 = vst.msk [vmem:[%s3418_s3] sm:$0xff] (!%p1196_p11), %vm217_vm0, %v1480_v0  ;;  %219 = vst.msk [vmem:[%s3418_s3 + $0x8] sm:$0xff] (!%p1196_p11), %vm217_vm0, %v1480_v0 }
  0x20   : > { %220 = vst.msk [vmem:[%s3418_s3 + $0x10] sm:$0xff] (!%p1196_p11), %vm217_vm0, %v1480_v0  ;;  %221 = vst.msk [vmem:[%s3418_s3 + $0x18] sm:$0xff] (!%p1196_p11), %vm217_vm0, %v1480_v0 }
  0x21   : > { %222 = vst.msk [vmem:[%s3418_s3 + $0x20] sm:$0xff] (!%p1196_p11), %vm217_vm0, %v1480_v0  ;;  %223 = vst.msk [vmem:[%s3418_s3 + $0x28] sm:$0xff] (!%p1196_p11), %vm217_vm0, %v1480_v0 }
  0x22   : > { %224 = vst.msk [vmem:[%s3418_s3 + $0x30] sm:$0xff] (!%p1196_p11), %vm217_vm0, %v1480_v0  ;;  %225 = vst.msk [vmem:[%s3418_s3 + $0x38] sm:$0xff] (!%p1196_p11), %vm217_vm0, %v1480_v0 }
  0x23   : > { %226 = vst.msk [vmem:[%s3418_s3 + $0x40] sm:$0xff] (!%p1196_p11), %vm217_vm0, %v1480_v0  ;;  %227 = vst.msk [vmem:[%s3418_s3 + $0x48] sm:$0xff] (!%p1196_p11), %vm217_vm0, %v1480_v0 }
  0x24   : > { %228 = vst.msk [vmem:[%s3418_s3 + $0x50] sm:$0xff] (!%p1196_p11), %vm217_vm0, %v1480_v0  ;;  %229 = vst.msk [vmem:[%s3418_s3 + $0x58] sm:$0xff] (!%p1196_p11), %vm217_vm0, %v1480_v0 }
  0x25   : > { %230 = vst.msk [vmem:[%s3418_s3 + $0x60] sm:$0xff] (!%p1196_p11), %vm217_vm0, %v1480_v0  ;;  %231 = vst.msk [vmem:[%s3418_s3 + $0x68] sm:$0xff] (!%p1196_p11), %vm217_vm0, %v1480_v0 }
  0x26   : > { %232 = vst.msk [vmem:[%s3418_s3 + $0x70] sm:$0xff] %vm217_vm0, %v1480_v0  ;;  %233 = vst.msk [vmem:[%s3418_s3 + $0x78] sm:$0xff] %vm217_vm0, %v1480_v0 }
  0x27   : > { %234 = vst.msk [vmem:[%s3418_s3 + $0x80] sm:$0xff] %vm217_vm0, %v1480_v0  ;;  %235 = vst.msk [vmem:[%s3418_s3 + $0x88] sm:$0xff] %vm217_vm0, %v1480_v0 }
  0x28   : > { %236 = vst.msk [vmem:[%s3418_s3 + $0x90] sm:$0xff] %vm217_vm0, %v1480_v0  ;;  %237 = vst.msk [vmem:[%s3418_s3 + $0x98] sm:$0xff] %vm217_vm0, %v1480_v0 }
  0x29   : > { %238 = vst.msk [vmem:[%s3418_s3 + $0xa0] sm:$0xff] %vm217_vm0, %v1480_v0  ;;  %239 = vst.msk [vmem:[%s3418_s3 + $0xa8] sm:$0xff] %vm217_vm0, %v1480_v0 }
  0x2a   : > { %240 = vst.msk [vmem:[%s3418_s3 + $0xb0] sm:$0xff] %vm217_vm0, %v1480_v0  ;;  %241 = vst.msk [vmem:[%s3418_s3 + $0xb8] sm:$0xff] %vm217_vm0, %v1480_v0 }
  0x2b   : > { %242 = vst.msk [vmem:[%s3418_s3 + $0xc0] sm:$0xff] %vm217_vm0, %v1480_v0  ;;  %243 = vst.msk [vmem:[%s3418_s3 + $0xc8] sm:$0xff] %vm217_vm0, %v1480_v0 }
  0x2c   : > { %244 = vst.msk [vmem:[%s3418_s3 + $0xd0] sm:$0xff] %vm217_vm0, %v1480_v0  ;;  %245 = vst.msk [vmem:[%s3418_s3 + $0xd8] sm:$0xff] %vm217_vm0, %v1480_v0 }
  0x2d   : > { %246 = vst.msk [vmem:[%s3418_s3 + $0xe0] sm:$0xff] %vm217_vm0, %v1480_v0  ;;  %247 = vst.msk [vmem:[%s3418_s3 + $0xe8] sm:$0xff] %vm217_vm0, %v1480_v0 }
  0x2e   : > { %248 = vst.msk [vmem:[%s3418_s3 + $0xf0] sm:$0xff] %vm217_vm0, %v1480_v0  ;;  %249 = vst.msk [vmem:[%s3418_s3 + $0xf8] sm:$0xff] %vm217_vm0, %v1480_v0 }
  0x2f   : > { %250 = vst.msk [vmem:[%s3418_s3 + $0x100] sm:$0xff] %vm217_vm0, %v1480_v0  ;;  %251 = vst.msk [vmem:[%s3418_s3 + $0x108] sm:$0xff] %vm217_vm0, %v1480_v0 }
  0x30   : > { %252 = vst.msk [vmem:[%s3418_s3 + $0x110] sm:$0xff] %vm217_vm0, %v1480_v0  ;;  %253 = vst.msk [vmem:[%s3418_s3 + $0x118] sm:$0xff] %vm217_vm0, %v1480_v0 }
  0x31   : > { %254 = vst.msk [vmem:[%s3418_s3 + $0x120] sm:$0xff] %vm217_vm0, %v1480_v0  ;;  %255 = vst.msk [vmem:[%s3418_s3 + $0x128] sm:$0xff] %vm217_vm0, %v1480_v0 }
  0x32   : > { %256 = vst.msk [vmem:[%s3418_s3 + $0x130] sm:$0xff] %vm217_vm0, %v1480_v0  ;;  %257 = vst.msk [vmem:[%s3418_s3 + $0x138] sm:$0xff] %vm217_vm0, %v1480_v0 }
  0x33   : > { %258 = vst.msk [vmem:[%s3418_s3 + $0x140] sm:$0xff] %vm217_vm0, %v1480_v0  ;;  %259 = vst.msk [vmem:[%s3418_s3 + $0x148] sm:$0xff] %vm217_vm0, %v1480_v0 }
  0x34   : > { %260 = vst.msk [vmem:[%s3418_s3 + $0x150] sm:$0xff] %vm217_vm0, %v1480_v0  ;;  %261 = vst.msk [vmem:[%s3418_s3 + $0x158] sm:$0xff] %vm217_vm0, %v1480_v0 }
  0x35   : > { %262 = vst.msk [vmem:[%s3418_s3 + $0x160] sm:$0xff] %vm217_vm0, %v1480_v0  ;;  %263 = vst.msk [vmem:[%s3418_s3 + $0x168] sm:$0xff] %vm217_vm0, %v1480_v0 }
  0x36   : > { %264 = vst.msk [vmem:[%s3418_s3 + $0x170] sm:$0xff] %vm217_vm0, %v1480_v0  ;;  %265 = vst.msk [vmem:[%s3418_s3 + $0x178] sm:$0xff] %vm217_vm0, %v1480_v0 }
  0x37   : > { %266 = vst.msk [vmem:[%s3418_s3 + $0x180] sm:$0xff] %vm217_vm0, %v1480_v0  ;;  %267 = vst.msk [vmem:[%s3418_s3 + $0x188] sm:$0xff] %vm217_vm0, %v1480_v0 }
  0x38   : > { %268 = vst.msk [vmem:[%s3418_s3 + $0x190] sm:$0xff] %vm217_vm0, %v1480_v0  ;;  %269 = vst.msk [vmem:[%s3418_s3 + $0x198] sm:$0xff] %vm217_vm0, %v1480_v0 }
  0x39   : > { %270 = vst.msk [vmem:[%s3418_s3 + $0x1a0] sm:$0xff] %vm217_vm0, %v1480_v0  ;;  %271 = vst.msk [vmem:[%s3418_s3 + $0x1a8] sm:$0xff] %vm217_vm0, %v1480_v0 }
  0x3a   : > { %272 = vst.msk [vmem:[%s3418_s3 + $0x1b0] sm:$0xff] %vm217_vm0, %v1480_v0  ;;  %273 = vst.msk [vmem:[%s3418_s3 + $0x1b8] sm:$0xff] %vm217_vm0, %v1480_v0 }
  0x3b   : > { %274 = vst.msk [vmem:[%s3418_s3 + $0x1c0] sm:$0xff] %vm217_vm0, %v1480_v0  ;;  %275 = vst.msk [vmem:[%s3418_s3 + $0x1c8] sm:$0xff] %vm217_vm0, %v1480_v0 }
  0x3c   : > { %276 = vst.msk [vmem:[%s3418_s3 + $0x1d0] sm:$0xff] %vm217_vm0, %v1480_v0  ;;  %277 = vst.msk [vmem:[%s3418_s3 + $0x1d8] sm:$0xff] %vm217_vm0, %v1480_v0 }
  0x3d   : > { %278 = vst.msk [vmem:[%s3418_s3 + $0x1e0] sm:$0xff] %vm217_vm0, %v1480_v0  ;;  %279 = vst.msk [vmem:[%s3418_s3 + $0x1e8] sm:$0xff] %vm217_vm0, %v1480_v0 }
  0x3e   : > { %280 = vst.msk [vmem:[%s3418_s3 + $0x1f0] sm:$0xff] %vm217_vm0, %v1480_v0  ;;  %281 = vst.msk [vmem:[%s3418_s3 + $0x1f8] sm:$0xff] %vm217_vm0, %v1480_v0 }
  0x3f   : > { %282 = vst.msk [vmem:[%s3418_s3 + $0x200] sm:$0xff] %vm217_vm0, %v1480_v0  ;;  %283 = vst.msk [vmem:[%s3418_s3 + $0x208] sm:$0xff] %vm217_vm0, %v1480_v0 }
  0x40   : > { %284 = vst.msk [vmem:[%s3418_s3 + $0x210] sm:$0xff] %vm217_vm0, %v1480_v0  ;;  %285 = vst.msk [vmem:[%s3418_s3 + $0x218] sm:$0xff] %vm217_vm0, %v1480_v0 }
  0x41   : > { %286 = vst.msk [vmem:[%s3418_s3 + $0x220] sm:$0xff] %vm217_vm0, %v1480_v0  ;;  %287 = vst.msk [vmem:[%s3418_s3 + $0x228] sm:$0xff] %vm217_vm0, %v1480_v0 }
  0x42   : > { %288 = vst.msk [vmem:[%s3418_s3 + $0x230] sm:$0xff] %vm217_vm0, %v1480_v0  ;;  %289 = vst.msk [vmem:[%s3418_s3 + $0x238] sm:$0xff] %vm217_vm0, %v1480_v0 }
  0x43   : > { %290 = vst.msk [vmem:[%s3418_s3 + $0x240] sm:$0xff] %vm217_vm0, %v1480_v0  ;;  %291 = vst.msk [vmem:[%s3418_s3 + $0x248] sm:$0xff] %vm217_vm0, %v1480_v0 }
  0x44   : > { %292 = vst.msk [vmem:[%s3418_s3 + $0x250] sm:$0xff] %vm217_vm0, %v1480_v0  ;;  %293 = vst.msk [vmem:[%s3418_s3 + $0x258] sm:$0xff] %vm217_vm0, %v1480_v0 }
  0x45   : > { %294 = vst.msk [vmem:[%s3418_s3 + $0x260] sm:$0xff] %vm217_vm0, %v1480_v0  ;;  %295 = vst.msk [vmem:[%s3418_s3 + $0x268] sm:$0xff] %vm217_vm0, %v1480_v0 }
  0x46   : > { %296 = vst.msk [vmem:[%s3418_s3 + $0x270] sm:$0xff] %vm217_vm0, %v1480_v0  ;;  %297 = vst.msk [vmem:[%s3418_s3 + $0x278] sm:$0xff] %vm217_vm0, %v1480_v0 }
  0x47   : > { %298 = vst.msk [vmem:[%s3418_s3 + $0x280] sm:$0xff] %vm217_vm0, %v1480_v0  ;;  %299 = vst.msk [vmem:[%s3418_s3 + $0x288] sm:$0xff] %vm217_vm0, %v1480_v0 }
  0x48   : > { %300 = vst.msk [vmem:[%s3418_s3 + $0x290] sm:$0xff] %vm217_vm0, %v1480_v0  ;;  %301 = vst.msk [vmem:[%s3418_s3 + $0x298] sm:$0xff] %vm217_vm0, %v1480_v0 }
  0x49   : > { %302 = vst.msk [vmem:[%s3418_s3 + $0x2a0] sm:$0xff] %vm217_vm0, %v1480_v0  ;;  %303 = vst.msk [vmem:[%s3418_s3 + $0x2a8] sm:$0xff] %vm217_vm0, %v1480_v0 }
  0x4a   : > { %304 = vst.msk [vmem:[%s3418_s3 + $0x2b0] sm:$0xff] %vm217_vm0, %v1480_v0  ;;  %305 = vst.msk [vmem:[%s3418_s3 + $0x2b8] sm:$0xff] %vm217_vm0, %v1480_v0 }
  0x4b   : > { %306 = vst.msk [vmem:[%s3418_s3 + $0x2c0] sm:$0xff] %vm217_vm0, %v1480_v0  ;;  %307 = vst.msk [vmem:[%s3418_s3 + $0x2c8] sm:$0xff] %vm217_vm0, %v1480_v0 }
  0x4c   : > { %308 = vst.msk [vmem:[%s3418_s3 + $0x2d0] sm:$0xff] %vm217_vm0, %v1480_v0  ;;  %309 = vst.msk [vmem:[%s3418_s3 + $0x2d8] sm:$0xff] %vm217_vm0, %v1480_v0 }
  0x4d   : > { %310 = vst.msk [vmem:[%s3418_s3 + $0x2e0] sm:$0xff] %vm217_vm0, %v1480_v0  ;;  %311 = vst.msk [vmem:[%s3418_s3 + $0x2e8] sm:$0xff] %vm217_vm0, %v1480_v0 }
  0x4e   : > { %312 = vst.msk [vmem:[%s3418_s3 + $0x2f0] sm:$0xff] %vm217_vm0, %v1480_v0  ;;  %313 = vst.msk [vmem:[%s3418_s3 + $0x2f8] sm:$0xff] %vm217_vm0, %v1480_v0 }
  0x4f   : > { %314 = vst.msk [vmem:[%s3418_s3 + $0x300] sm:$0xff] %vm217_vm0, %v1480_v0  ;;  %315 = vst.msk [vmem:[%s3418_s3 + $0x308] sm:$0xff] %vm217_vm0, %v1480_v0 }
  0x50   : > { %316 = vst.msk [vmem:[%s3418_s3 + $0x310] sm:$0xff] %vm217_vm0, %v1480_v0  ;;  %317 = vst.msk [vmem:[%s3418_s3 + $0x318] sm:$0xff] %vm217_vm0, %v1480_v0 }
  0x51   : > { %318 = vst.msk [vmem:[%s3418_s3 + $0x320] sm:$0xff] %vm217_vm0, %v1480_v0  ;;  %319 = vst.msk [vmem:[%s3418_s3 + $0x328] sm:$0xff] %vm217_vm0, %v1480_v0 }
  0x52   : > { %320 = vst.msk [vmem:[%s3418_s3 + $0x330] sm:$0xff] %vm217_vm0, %v1480_v0  ;;  %321 = vst.msk [vmem:[%s3418_s3 + $0x338] sm:$0xff] %vm217_vm0, %v1480_v0 }
  0x53   : > { %322 = vst.msk [vmem:[%s3418_s3 + $0x340] sm:$0xff] %vm217_vm0, %v1480_v0  ;;  %323 = vst.msk [vmem:[%s3418_s3 + $0x348] sm:$0xff] %vm217_vm0, %v1480_v0 }
  0x54   : > { %324 = vst.msk [vmem:[%s3418_s3 + $0x350] sm:$0xff] %vm217_vm0, %v1480_v0  ;;  %325 = vst.msk [vmem:[%s3418_s3 + $0x358] sm:$0xff] %vm217_vm0, %v1480_v0 }
  0x55   : > { %326 = vst.msk [vmem:[%s3418_s3 + $0x360] sm:$0xff] %vm217_vm0, %v1480_v0  ;;  %327 = vst.msk [vmem:[%s3418_s3 + $0x368] sm:$0xff] %vm217_vm0, %v1480_v0 }
  0x56   : > { %328 = vst.msk [vmem:[%s3418_s3 + $0x370] sm:$0xff] %vm217_vm0, %v1480_v0  ;;  %329 = vst.msk [vmem:[%s3418_s3 + $0x378] sm:$0xff] %vm217_vm0, %v1480_v0 }
  0x57   : > { %330 = vst.msk [vmem:[%s3418_s3 + $0x380] sm:$0xff] %vm217_vm0, %v1480_v0  ;;  %331 = vst.msk [vmem:[%s3418_s3 + $0x388] sm:$0xff] %vm217_vm0, %v1480_v0 }
  0x58   : > { %332 = vst.msk [vmem:[%s3418_s3 + $0x390] sm:$0xff] %vm217_vm0, %v1480_v0  ;;  %333 = vst.msk [vmem:[%s3418_s3 + $0x398] sm:$0xff] %vm217_vm0, %v1480_v0 }
  0x59   : > { %334 = vst.msk [vmem:[%s3418_s3 + $0x3a0] sm:$0xff] %vm217_vm0, %v1480_v0  ;;  %335 = vst.msk [vmem:[%s3418_s3 + $0x3a8] sm:$0xff] %vm217_vm0, %v1480_v0 }
  0x5a   : > { %336 = vst.msk [vmem:[%s3418_s3 + $0x3b0] sm:$0xff] %vm217_vm0, %v1480_v0  ;;  %337 = vst.msk [vmem:[%s3418_s3 + $0x3b8] sm:$0xff] %vm217_vm0, %v1480_v0 }
  0x5b   : > { %338 = vst.msk [vmem:[%s3418_s3 + $0x3c0] sm:$0xff] %vm217_vm0, %v1480_v0  ;;  %339 = vst.msk [vmem:[%s3418_s3 + $0x3c8] sm:$0xff] %vm217_vm0, %v1480_v0 }
  0x5c   : > { %340 = vst.msk [vmem:[%s3418_s3 + $0x3d0] sm:$0xff] %vm217_vm0, %v1480_v0  ;;  %341 = vst.msk [vmem:[%s3418_s3 + $0x3d8] sm:$0xff] %vm217_vm0, %v1480_v0 }
  0x5d   : > { %342 = vst.msk [vmem:[%s3418_s3 + $0x3e0] sm:$0xff] %vm217_vm0, %v1480_v0  ;;  %343 = vst.msk [vmem:[%s3418_s3 + $0x3e8] sm:$0xff] %vm217_vm0, %v1480_v0 }
  0x5e   : > { %344 = vst.msk [vmem:[%s3418_s3 + $0x3f0] sm:$0xff] %vm217_vm0, %v1480_v0  ;;  %345 = vst.msk [vmem:[%s3418_s3 + $0x3f8] sm:$0xff] %vm217_vm0, %v1480_v0 }
  0x5f   : > { %346 = vst.msk [vmem:[%s3418_s3 + $0x400] sm:$0xff] %vm217_vm0, %v1480_v0  ;;  %347 = vst.msk [vmem:[%s3418_s3 + $0x408] sm:$0xff] %vm217_vm0, %v1480_v0 }
  0x60   : > { %348 = vst.msk [vmem:[%s3418_s3 + $0x410] sm:$0xff] %vm217_vm0, %v1480_v0  ;;  %349 = vst.msk [vmem:[%s3418_s3 + $0x418] sm:$0xff] %vm217_vm0, %v1480_v0 }
  0x61   : > { %350 = vst.msk [vmem:[%s3418_s3 + $0x420] sm:$0xff] %vm217_vm0, %v1480_v0  ;;  %351 = vst.msk [vmem:[%s3418_s3 + $0x428] sm:$0xff] %vm217_vm0, %v1480_v0 }
  0x62   : > { %352 = vst.msk [vmem:[%s3418_s3 + $0x430] sm:$0xff] %vm217_vm0, %v1480_v0  ;;  %353 = vst.msk [vmem:[%s3418_s3 + $0x438] sm:$0xff] %vm217_vm0, %v1480_v0 }
  0x63   : > { %354 = vst.msk [vmem:[%s3418_s3 + $0x440] sm:$0xff] %vm217_vm0, %v1480_v0  ;;  %355 = vst.msk [vmem:[%s3418_s3 + $0x448] sm:$0xff] %vm217_vm0, %v1480_v0 }
  0x64   : > { %356 = vst.msk [vmem:[%s3418_s3 + $0x450] sm:$0xff] %vm217_vm0, %v1480_v0  ;;  %357 = vst.msk [vmem:[%s3418_s3 + $0x458] sm:$0xff] %vm217_vm0, %v1480_v0 }
  0x65   : > { %358 = vst.msk [vmem:[%s3418_s3 + $0x460] sm:$0xff] %vm217_vm0, %v1480_v0  ;;  %359 = vst.msk [vmem:[%s3418_s3 + $0x468] sm:$0xff] %vm217_vm0, %v1480_v0 }
  0x66   : > { %360 = vst.msk [vmem:[%s3418_s3 + $0x470] sm:$0xff] %vm217_vm0, %v1480_v0  ;;  %361 = vst.msk [vmem:[%s3418_s3 + $0x478] sm:$0xff] %vm217_vm0, %v1480_v0 }
  0x67   : > { %362 = vst.msk [vmem:[%s3418_s3 + $0x480] sm:$0xff] %vm217_vm0, %v1480_v0  ;;  %363 = vst.msk [vmem:[%s3418_s3 + $0x488] sm:$0xff] %vm217_vm0, %v1480_v0 }
  0x68   : > { %364 = vst.msk [vmem:[%s3418_s3 + $0x490] sm:$0xff] %vm217_vm0, %v1480_v0  ;;  %365 = vst.msk [vmem:[%s3418_s3 + $0x498] sm:$0xff] %vm217_vm0, %v1480_v0 }
  0x69   : > { %366 = vst.msk [vmem:[%s3418_s3 + $0x4a0] sm:$0xff] %vm217_vm0, %v1480_v0  ;;  %367 = vst.msk [vmem:[%s3418_s3 + $0x4a8] sm:$0xff] %vm217_vm0, %v1480_v0 }
  0x6a   : > { %368 = vst.msk [vmem:[%s3418_s3 + $0x4b0] sm:$0xff] %vm217_vm0, %v1480_v0  ;;  %369 = vst.msk [vmem:[%s3418_s3 + $0x4b8] sm:$0xff] %vm217_vm0, %v1480_v0 }
  0x6b   : > { %370 = vst.msk [vmem:[%s3418_s3 + $0x4c0] sm:$0xff] %vm217_vm0, %v1480_v0  ;;  %371 = vst.msk [vmem:[%s3418_s3 + $0x4c8] sm:$0xff] %vm217_vm0, %v1480_v0 }
  0x6c   : > { %372 = vst.msk [vmem:[%s3418_s3 + $0x4d0] sm:$0xff] %vm217_vm0, %v1480_v0  ;;  %373 = vst.msk [vmem:[%s3418_s3 + $0x4d8] sm:$0xff] %vm217_vm0, %v1480_v0 }
  0x6d   : > { %374 = vst.msk [vmem:[%s3418_s3 + $0x4e0] sm:$0xff] %vm217_vm0, %v1480_v0  ;;  %375 = vst.msk [vmem:[%s3418_s3 + $0x4e8] sm:$0xff] %vm217_vm0, %v1480_v0 }
  0x6e   : > { %376 = vst.msk [vmem:[%s3418_s3 + $0x4f0] sm:$0xff] %vm217_vm0, %v1480_v0  ;;  %377 = vst.msk [vmem:[%s3418_s3 + $0x4f8] sm:$0xff] %vm217_vm0, %v1480_v0 }
  0x6f   : > { %378 = vst.msk [vmem:[%s3418_s3 + $0x500] sm:$0xff] %vm217_vm0, %v1480_v0  ;;  %379 = vst.msk [vmem:[%s3418_s3 + $0x508] sm:$0xff] %vm217_vm0, %v1480_v0 }
  0x70   : > { %380 = vst.msk [vmem:[%s3418_s3 + $0x510] sm:$0xff] %vm217_vm0, %v1480_v0  ;;  %381 = vst.msk [vmem:[%s3418_s3 + $0x518] sm:$0xff] %vm217_vm0, %v1480_v0 }
  0x71   : > { %382 = vst.msk [vmem:[%s3418_s3 + $0x520] sm:$0xff] %vm217_vm0, %v1480_v0  ;;  %383 = vst.msk [vmem:[%s3418_s3 + $0x528] sm:$0xff] %vm217_vm0, %v1480_v0 }
  0x72   : > { %384 = vst.msk [vmem:[%s3418_s3 + $0x530] sm:$0xff] %vm217_vm0, %v1480_v0  ;;  %385 = vst.msk [vmem:[%s3418_s3 + $0x538] sm:$0xff] %vm217_vm0, %v1480_v0 }
  0x73   : > { %386 = vst.msk [vmem:[%s3418_s3 + $0x540] sm:$0xff] %vm217_vm0, %v1480_v0  ;;  %387 = vst.msk [vmem:[%s3418_s3 + $0x548] sm:$0xff] %vm217_vm0, %v1480_v0 }
  0x74   : > { %388 = vst.msk [vmem:[%s3418_s3 + $0x550] sm:$0xff] %vm217_vm0, %v1480_v0  ;;  %389 = vst.msk [vmem:[%s3418_s3 + $0x558] sm:$0xff] %vm217_vm0, %v1480_v0 }
  0x75   : > { %390 = vst.msk [vmem:[%s3418_s3 + $0x560] sm:$0xff] %vm217_vm0, %v1480_v0  ;;  %391 = vst.msk [vmem:[%s3418_s3 + $0x568] sm:$0xff] %vm217_vm0, %v1480_v0 }
  0x76   : > { %392 = vst.msk [vmem:[%s3418_s3 + $0x570] sm:$0xff] %vm217_vm0, %v1480_v0  ;;  %393 = vst.msk [vmem:[%s3418_s3 + $0x578] sm:$0xff] %vm217_vm0, %v1480_v0 }
  0x77   : > { %394 = vst.msk [vmem:[%s3418_s3 + $0x580] sm:$0xff] %vm217_vm0, %v1480_v0  ;;  %395 = vst.msk [vmem:[%s3418_s3 + $0x588] sm:$0xff] %vm217_vm0, %v1480_v0 }
  0x78   : > { %396 = vst.msk [vmem:[%s3418_s3 + $0x590] sm:$0xff] %vm217_vm0, %v1480_v0  ;;  %397 = vst.msk [vmem:[%s3418_s3 + $0x598] sm:$0xff] %vm217_vm0, %v1480_v0 }
  0x79   : > { %398 = vst.msk [vmem:[%s3418_s3 + $0x5a0] sm:$0xff] %vm217_vm0, %v1480_v0  ;;  %399 = vst.msk [vmem:[%s3418_s3 + $0x5a8] sm:$0xff] %vm217_vm0, %v1480_v0 }
  0x7a   : > { %400 = vst.msk [vmem:[%s3418_s3 + $0x5b0] sm:$0xff] %vm217_vm0, %v1480_v0  ;;  %401 = vst.msk [vmem:[%s3418_s3 + $0x5b8] sm:$0xff] %vm217_vm0, %v1480_v0 }
  0x7b   : > { %402 = vst.msk [vmem:[%s3418_s3 + $0x5c0] sm:$0xff] %vm217_vm0, %v1480_v0  ;;  %403 = vst.msk [vmem:[%s3418_s3 + $0x5c8] sm:$0xff] %vm217_vm0, %v1480_v0 }
  0x7c   : > { %404 = vst.msk [vmem:[%s3418_s3 + $0x5d0] sm:$0xff] %vm217_vm0, %v1480_v0  ;;  %405 = vst.msk [vmem:[%s3418_s3 + $0x5d8] sm:$0xff] %vm217_vm0, %v1480_v0 }
  0x7d   : > { %406 = vst.msk [vmem:[%s3418_s3 + $0x5e0] sm:$0xff] %vm217_vm0, %v1480_v0  ;;  %407 = vst.msk [vmem:[%s3418_s3 + $0x5e8] sm:$0xff] %vm217_vm0, %v1480_v0 }
  0x7e   : > { %408 = vst.msk [vmem:[%s3418_s3 + $0x5f0] sm:$0xff] %vm217_vm0, %v1480_v0  ;;  %409 = vst.msk [vmem:[%s3418_s3 + $0x5f8] sm:$0xff] %vm217_vm0, %v1480_v0 }
  0x7f   : > { %410 = vst.msk [vmem:[%s3418_s3 + $0x600] sm:$0xff] %vm217_vm0, %v1480_v0  ;;  %411 = vst.msk [vmem:[%s3418_s3 + $0x608] sm:$0xff] %vm217_vm0, %v1480_v0 }
  0x80   : > { %412 = vst.msk [vmem:[%s3418_s3 + $0x610] sm:$0xff] %vm217_vm0, %v1480_v0  ;;  %413 = vst.msk [vmem:[%s3418_s3 + $0x618] sm:$0xff] %vm217_vm0, %v1480_v0 }
  0x81   : > { %414 = vst.msk [vmem:[%s3418_s3 + $0x620] sm:$0xff] %vm217_vm0, %v1480_v0  ;;  %415 = vst.msk [vmem:[%s3418_s3 + $0x628] sm:$0xff] %vm217_vm0, %v1480_v0 }
  0x82   : > { %416 = vst.msk [vmem:[%s3418_s3 + $0x630] sm:$0xff] %vm217_vm0, %v1480_v0  ;;  %417 = vst.msk [vmem:[%s3418_s3 + $0x638] sm:$0xff] %vm217_vm0, %v1480_v0 }
  0x83   : > { %418 = vst.msk [vmem:[%s3418_s3 + $0x640] sm:$0xff] %vm217_vm0, %v1480_v0  ;;  %419 = vst.msk [vmem:[%s3418_s3 + $0x648] sm:$0xff] %vm217_vm0, %v1480_v0 }
  0x84   : > { %420 = vst.msk [vmem:[%s3418_s3 + $0x650] sm:$0xff] %vm217_vm0, %v1480_v0  ;;  %421 = vst.msk [vmem:[%s3418_s3 + $0x658] sm:$0xff] %vm217_vm0, %v1480_v0 }
  0x85   : > { %422 = vst.msk [vmem:[%s3418_s3 + $0x660] sm:$0xff] %vm217_vm0, %v1480_v0  ;;  %423 = vst.msk [vmem:[%s3418_s3 + $0x668] sm:$0xff] %vm217_vm0, %v1480_v0 }
  0x86   : > { %424 = vst.msk [vmem:[%s3418_s3 + $0x670] sm:$0xff] %vm217_vm0, %v1480_v0  ;;  %425 = vst.msk [vmem:[%s3418_s3 + $0x678] sm:$0xff] %vm217_vm0, %v1480_v0 }
  0x87   : > { %426 = vst.msk [vmem:[%s3418_s3 + $0x680] sm:$0xff] %vm217_vm0, %v1480_v0  ;;  %427 = vst.msk [vmem:[%s3418_s3 + $0x688] sm:$0xff] %vm217_vm0, %v1480_v0 }
  0x88   : > { %428 = vst.msk [vmem:[%s3418_s3 + $0x690] sm:$0xff] %vm217_vm0, %v1480_v0  ;;  %429 = vst.msk [vmem:[%s3418_s3 + $0x698] sm:$0xff] %vm217_vm0, %v1480_v0 }
  0x89   : > { %430 = vst.msk [vmem:[%s3418_s3 + $0x6a0] sm:$0xff] %vm217_vm0, %v1480_v0  ;;  %431 = vst.msk [vmem:[%s3418_s3 + $0x6a8] sm:$0xff] %vm217_vm0, %v1480_v0 }
  0x8a   : > { %432 = vst.msk [vmem:[%s3418_s3 + $0x6b0] sm:$0xff] %vm217_vm0, %v1480_v0  ;;  %433 = vst.msk [vmem:[%s3418_s3 + $0x6b8] sm:$0xff] %vm217_vm0, %v1480_v0 }
  0x8b   : > { %434 = vst.msk [vmem:[%s3418_s3 + $0x6c0] sm:$0xff] %vm217_vm0, %v1480_v0  ;;  %435 = vst.msk [vmem:[%s3418_s3 + $0x6c8] sm:$0xff] %vm217_vm0, %v1480_v0 }
  0x8c   : > { %436 = vst.msk [vmem:[%s3418_s3 + $0x6d0] sm:$0xff] %vm217_vm0, %v1480_v0  ;;  %437 = vst.msk [vmem:[%s3418_s3 + $0x6d8] sm:$0xff] %vm217_vm0, %v1480_v0 }
  0x8d   : > { %438 = vst.msk [vmem:[%s3418_s3 + $0x6e0] sm:$0xff] %vm217_vm0, %v1480_v0  ;;  %439 = vst.msk [vmem:[%s3418_s3 + $0x6e8] sm:$0xff] %vm217_vm0, %v1480_v0 }
  0x8e   : > { %440 = vst.msk [vmem:[%s3418_s3 + $0x6f0] sm:$0xff] %vm217_vm0, %v1480_v0  ;;  %441 = vst.msk [vmem:[%s3418_s3 + $0x6f8] sm:$0xff] %vm217_vm0, %v1480_v0 }
  0x8f   : > { %442 = vst.msk [vmem:[%s3418_s3 + $0x700] sm:$0xff] %vm217_vm0, %v1480_v0  ;;  %443 = vst.msk [vmem:[%s3418_s3 + $0x708] sm:$0xff] %vm217_vm0, %v1480_v0 }
  0x90   : > { %444 = vst.msk [vmem:[%s3418_s3 + $0x710] sm:$0xff] %vm217_vm0, %v1480_v0  ;;  %445 = vst.msk [vmem:[%s3418_s3 + $0x718] sm:$0xff] %vm217_vm0, %v1480_v0 }
  0x91   : > { %446 = vst.msk [vmem:[%s3418_s3 + $0x720] sm:$0xff] %vm217_vm0, %v1480_v0  ;;  %447 = vst.msk [vmem:[%s3418_s3 + $0x728] sm:$0xff] %vm217_vm0, %v1480_v0 }
  0x92   : > { %448 = vst.msk [vmem:[%s3418_s3 + $0x730] sm:$0xff] %vm217_vm0, %v1480_v0  ;;  %449 = vst.msk [vmem:[%s3418_s3 + $0x738] sm:$0xff] %vm217_vm0, %v1480_v0 }
  0x93   : > { %450 = vst.msk [vmem:[%s3418_s3 + $0x740] sm:$0xff] %vm217_vm0, %v1480_v0  ;;  %451 = vst.msk [vmem:[%s3418_s3 + $0x748] sm:$0xff] %vm217_vm0, %v1480_v0 }
  0x94   : > { %452 = vst.msk [vmem:[%s3418_s3 + $0x750] sm:$0xff] %vm217_vm0, %v1480_v0  ;;  %453 = vst.msk [vmem:[%s3418_s3 + $0x758] sm:$0xff] %vm217_vm0, %v1480_v0 }
  0x95   : > { %454 = vst.msk [vmem:[%s3418_s3 + $0x760] sm:$0xff] %vm217_vm0, %v1480_v0  ;;  %455 = vst.msk [vmem:[%s3418_s3 + $0x768] sm:$0xff] %vm217_vm0, %v1480_v0 }
  0x96   : > { %456 = vst.msk [vmem:[%s3418_s3 + $0x770] sm:$0xff] %vm217_vm0, %v1480_v0  ;;  %457 = vst.msk [vmem:[%s3418_s3 + $0x778] sm:$0xff] %vm217_vm0, %v1480_v0 }
  0x97   : > { %458 = vst.msk [vmem:[%s3418_s3 + $0x780] sm:$0xff] %vm217_vm0, %v1480_v0  ;;  %459 = vst.msk [vmem:[%s3418_s3 + $0x788] sm:$0xff] %vm217_vm0, %v1480_v0 }
  0x98   : > { %460 = vst.msk [vmem:[%s3418_s3 + $0x790] sm:$0xff] %vm217_vm0, %v1480_v0  ;;  %461 = vst.msk [vmem:[%s3418_s3 + $0x798] sm:$0xff] %vm217_vm0, %v1480_v0 }
  0x99   : > { %462 = vst.msk [vmem:[%s3418_s3 + $0x7a0] sm:$0xff] %vm217_vm0, %v1480_v0  ;;  %463 = vst.msk [vmem:[%s3418_s3 + $0x7a8] sm:$0xff] %vm217_vm0, %v1480_v0 }
  0x9a   : > { %464 = vst.msk [vmem:[%s3418_s3 + $0x7b0] sm:$0xff] %vm217_vm0, %v1480_v0  ;;  %465 = vst.msk [vmem:[%s3418_s3 + $0x7b8] sm:$0xff] %vm217_vm0, %v1480_v0 }
  0x9b   : > { %466 = vst.msk [vmem:[%s3418_s3 + $0x7c0] sm:$0xff] %vm217_vm0, %v1480_v0  ;;  %467 = vst.msk [vmem:[%s3418_s3 + $0x7c8] sm:$0xff] %vm217_vm0, %v1480_v0 }
  0x9c   : > { %468 = vst.msk [vmem:[%s3418_s3 + $0x7d0] sm:$0xff] %vm217_vm0, %v1480_v0  ;;  %469 = vst.msk [vmem:[%s3418_s3 + $0x7d8] sm:$0xff] %vm217_vm0, %v1480_v0 }
  0x9d   : > { %470 = vst.msk [vmem:[%s3418_s3 + $0x7e0] sm:$0xff] %vm217_vm0, %v1480_v0  ;;  %471 = vst.msk [vmem:[%s3418_s3 + $0x7e8] sm:$0xff] %vm217_vm0, %v1480_v0 }
  0x9e   : > { %472 = vst.msk [vmem:[%s3418_s3 + $0x7f0] sm:$0xff] %vm217_vm0, %v1480_v0  ;;  %473 = vst.msk [vmem:[%s3418_s3 + $0x7f8] sm:$0xff] %vm217_vm0, %v1480_v0 }
  0x9f   : > { %474 = vst.msk [vmem:[%s3418_s3 + $0x800] sm:$0xff] %vm217_vm0, %v1480_v0  ;;  %475 = vst.msk [vmem:[%s3418_s3 + $0x808] sm:$0xff] %vm217_vm0, %v1480_v0 }
  0xa0 PF: > { %v754_v1 = vld [vmem:[%s1537_s28] sm:$0xff]  ;;  %v755_v2 = vld [vmem:[%s1537_s28 + $0x8] sm:$0xff]  ;;  %v756_v3 = vld [vmem:[%s1537_s28 + $0x10] sm:$0xff]  ;;  %s2834_s14 = sld [smem:[#allocation3 + %s1469_s17]]  ;;  %v479_v4 = vlaneseq  ;;  %v1481_v5 = vmov 0.0|0.0   ;;  %v1482_v26 = vmov 1.0  }
  0xa1   : > { %1333 = vmatprep.subr.bf16.mxu0 %v1481_v5  ;;  %v1334_v6 = vpack.c.bf16 %v755_v2, %v754_v1  ;;  %1381 = vmatprep.subr.bf16.mxu1 %v1481_v5  ;;  %v757_v7 = vld [vmem:[%s1537_s28 + $0x18] sm:$0xff]  ;;  %v758_v10 = vld [vmem:[%s1537_s28 + $0x20] sm:$0xff]  ;;  %v759_v11 = vld [vmem:[%s1537_s28 + $0x28] sm:$0xff] }
  0xa2   : > { %v1337_v8 = vpack.c.bf16 %v757_v7, %v756_v3  ;;  %v2839_v9 = vshrl.u32 %v479_v4, 7  ;;  %v1340_v14 = vpack.c.bf16 %v759_v11, %v758_v10  ;;  %v760_v16 = vld [vmem:[%s1537_s28 + $0x30] sm:$0xff]  ;;  %v761_v17 = vld [vmem:[%s1537_s28 + $0x38] sm:$0xff]  ;;  %v2866_v20 = vld [vmem:[%s193_s24] sm:$0x3] }
  0xa3   : > { %1335 = vmatpush1.bf16.msra.mxu0 %v1334_v6  ;;  %1397 = vmatpush1.bf16.msra.mxu1 %v1334_v6  ;;  %v1343_v21 = vpack.c.bf16 %v761_v17, %v760_v16  ;;  %v762_v23 = vld [vmem:[%s1537_s28 + $0x40] sm:$0xff]  ;;  %v763_v24 = vld [vmem:[%s1537_s28 + $0x48] sm:$0xff]  ;;  %v764_v33 = vld [vmem:[%s1537_s28 + $0x50] sm:$0xff] }
  0xa4   : > { %1336 = vmatprep.subr.bf16.mxu0 %v1481_v5  ;;  %1382 = vmatprep.subr.bf16.mxu1 %v1481_v5  ;;  %v497_v12 = vadd.s32 136, %v2839_v9  ;;  %v554_v15 = vsub.s32 1, %v2839_v9  ;;  %v484_v25 = vadd.s32 32, %v2839_v9  ;;  %v501_v27 = vadd.s32 168, %v2839_v9  ;;  %v765_v34 = vld [vmem:[%s1537_s28 + $0x58] sm:$0xff]  ;;  %v766_v42 = vld [vmem:[%s1537_s28 + $0x60] sm:$0xff] }
  0xa5   : > { %v485_v28 = vadd.s32 40, %v2839_v9  ;;  %v502_v29 = vadd.s32 176, %v2839_v9  ;;  %v486_v30 = vadd.s32 48, %v2839_v9  ;;  %v1346_v31 = vpack.c.bf16 %v763_v24, %v762_v23  ;;  %v767_v43 = vld [vmem:[%s1537_s28 + $0x68] sm:$0xff]  ;;  %v768_v48 = vld [vmem:[%s1537_s28 + $0x70] sm:$0xff]  ;;  %v769_v49 = vld [vmem:[%s1537_s28 + $0x78] sm:$0xff] }
  0xa6   : > { %v2847_v13 = vstv %s2834_s14  ;;  %v2869_v22 = vrot.slane %v2866_v20, %v554_v15  ;;  %v503_v32 = vadd.s32 184, %v2839_v9  ;;  %v487_v36 = vadd.s32 56, %v2839_v9  ;;  %v770_v62 = vld [vmem:[%s1537_s28 + $0x80] sm:$0xff]  ;;  %v771_v63 = vld [vmem:[%s1537_s28 + $0x88] sm:$0xff]  ;;  %v772_v11 = vld [vmem:[%s1537_s28 + $0x90] sm:$0xff] }
  0xa7   : > { %1338 = vmatpush1.bf16.msra.mxu0 %v1337_v8  ;;  %1398 = vmatpush1.bf16.msra.mxu1 %v1337_v8  ;;  %v2856_v18 = vadd.s32 %v2847_v13, %v2839_v9  ;;  %v2859_v19 = vadd.s32 %v2847_v13, %v497_v12  ;;  %v2892_v35 = vadd.s32 %v2847_v13, %v484_v25  ;;  %v504_v45 = vadd.s32 192, %v2839_v9  ;;  %v773_v12 = vld [vmem:[%s1537_s28 + $0x98] sm:$0xff] }
  0xa8   : > { %1339 = vmatprep.subr.bf16.mxu0 %v1481_v5  ;;  %1383 = vmatprep.subr.bf16.mxu1 %v1481_v5  ;;  %v2896_v37 = vadd.s32 %v2847_v13, %v501_v27  ;;  %v2899_v38 = vadd.s32 %v2847_v13, %v485_v28  ;;  %v2902_v39 = vadd.s32 %v2847_v13, %v502_v29  ;;  %v488_v46 = vadd.s32 64, %v2839_v9 }
  0xa9   : > { %vm557_vm1 = vcmp.eq.s32.totalorder %v2856_v18, %v2869_v22  ;;  %vm591_vm2 = vcmp.eq.s32.totalorder %v2859_v19, %v2869_v22  ;;  %v2905_v40 = vadd.s32 %v2847_v13, %v486_v30  ;;  %v1349_v41 = vpack.c.bf16 %v765_v34, %v764_v33  ;;  %v774_v30 = vld [vmem:[%s1537_s28 + $0xa0] sm:$0xff] }
  0xaa   : > { %1263 = vmatprep.mubr.msk.f32.mxu0 %vm557_vm1, %v1482_v26  ;;  %1297 = vmatprep.mubr.msk.f32.mxu1 %vm591_vm2, %v1482_v26  ;;  %vm565_vm3 = vcmp.eq.s32.totalorder %v2892_v35, %v2869_v22  ;;  %v2912_v44 = vadd.s32 %v2847_v13, %v503_v32  ;;  %vm599_vm4 = vcmp.eq.s32.totalorder %v2896_v37, %v2869_v22  ;;  %v505_v53 = vadd.s32 200, %v2839_v9 }
  0xab   : > { %1341 = vmatpush1.bf16.msra.mxu0 %v1340_v14  ;;  %1399 = vmatpush1.bf16.msra.mxu1 %v1340_v14  ;;  %vm567_vm5 = vcmp.eq.s32.totalorder %v2899_v38, %v2869_v22  ;;  %vm601_vm6 = vcmp.eq.s32.totalorder %v2902_v39, %v2869_v22  ;;  %vm569_vm7 = vcmp.eq.s32.totalorder %v2905_v40, %v2869_v22  ;;  %v489_v54 = vadd.s32 72, %v2839_v9 }
  0xac   : > { %1342 = vmatprep.subr.bf16.mxu0 %v1481_v5  ;;  %1384 = vmatprep.subr.bf16.mxu1 %v1481_v5  ;;  %v1352_v47 = vpack.c.bf16 %v767_v43, %v766_v42  ;;  %vm603_vm8 = vcmp.eq.s32.totalorder %v2912_v44, %v2869_v22  ;;  %v2931_v50 = vadd.s32 %v2847_v13, %v487_v36  ;;  %v506_v55 = vadd.s32 208, %v2839_v9 }
  0xad   : > { %v2934_v51 = vadd.s32 %v2847_v13, %v504_v45  ;;  %v2937_v52 = vadd.s32 %v2847_v13, %v488_v46  ;;  %v490_v56 = vadd.s32 80, %v2839_v9  ;;  %v1355_v57 = vpack.c.bf16 %v769_v49, %v768_v48  ;;  %v776_v46 = vld [vmem:[%s1537_s28 + $0xb0] sm:$0xff]  ;;  %v778_v49 = vld [vmem:[%s1537_s28 + $0xc0] sm:$0xff] }
  0xae   : > { %vm571_vm9 = vcmp.eq.s32.totalorder %v2931_v50, %v2869_v22  ;;  %v2952_v58 = vadd.s32 %v2847_v13, %v505_v53  ;;  %v2955_v59 = vadd.s32 %v2847_v13, %v489_v54  ;;  %v2958_v60 = vadd.s32 %v2847_v13, %v506_v55  ;;  %v779_v53 = vld [vmem:[%s1537_s28 + $0xc8] sm:$0xff]  ;;  %v780_v55 = vld [vmem:[%s1537_s28 + $0xd0] sm:$0xff] }
  0xaf   : > { %1344 = vmatpush1.bf16.msra.mxu0 %v1343_v21  ;;  %1400 = vmatpush1.bf16.msra.mxu1 %v1343_v21  ;;  %vm605_vm10 = vcmp.eq.s32.totalorder %v2934_v51, %v2869_v22  ;;  %v2961_v61 = vadd.s32 %v2847_v13, %v490_v56  ;;  %v507_v0 = vadd.s32 216, %v2839_v9  ;;  %v491_v1 = vadd.s32 88, %v2839_v9  ;;  %v781_v56 = vld [vmem:[%s1537_s28 + $0xd8] sm:$0xff] }
  0xb0   : > { %1345 = vmatprep.subr.bf16.mxu0 %v1481_v5  ;;  %1385 = vmatprep.subr.bf16.mxu1 %v1481_v5  ;;  %v508_v2 = vadd.s32 224, %v2839_v9  ;;  %v492_v3 = vadd.s32 96, %v2839_v9  ;;  %v509_v4 = vadd.s32 232, %v2839_v9  ;;  %v1358_v6 = vpack.c.bf16 %v771_v63, %v770_v62  ;;  %v782_v62 = vld [vmem:[%s1537_s28 + $0xe0] sm:$0xff]  ;;  %v783_v63 = vld [vmem:[%s1537_s28 + $0xe8] sm:$0xff] }
  0xb1   : > { %v2981_v7 = vadd.s32 %v2847_v13, %v507_v0  ;;  %v2984_v8 = vadd.s32 %v2847_v13, %v491_v1  ;;  %v493_v16 = vadd.s32 104, %v2839_v9  ;;  %v510_v17 = vadd.s32 240, %v2839_v9  ;;  %v784_v1 = vld [vmem:[%s1537_s28 + $0xf0] sm:$0xff] }
  0xb2   : > { %v2987_v10 = vadd.s32 %v2847_v13, %v508_v2  ;;  %v2992_v14 = vadd.s32 %v2847_v13, %v492_v3  ;;  %v2995_v15 = vadd.s32 %v2847_v13, %v509_v4  ;;  %v494_v21 = vadd.s32 112, %v2839_v9  ;;  %v785_v2 = vld [vmem:[%s1537_s28 + $0xf8] sm:$0xff] }
  0xb3   : > { %1347 = vmatpush1.bf16.msra.mxu0 %v1346_v31  ;;  %1401 = vmatpush1.bf16.msra.mxu1 %v1346_v31  ;;  %v1361_v23 = vpack.c.bf16 %v773_v12, %v772_v11  ;;  %v3013_v24 = vadd.s32 %v2847_v13, %v493_v16  ;;  %v3016_v25 = vadd.s32 %v2847_v13, %v510_v17  ;;  %v511_v28 = vadd.s32 248, %v2839_v9  ;;  %v775_v31 = vld [vmem:[%s1537_s28 + $0xa8] sm:$0xff] }
  0xb4   : > { %1348 = vmatprep.subr.bf16.mxu0 %v1481_v5  ;;  %1386 = vmatprep.subr.bf16.mxu1 %v1481_v5  ;;  %v3019_v27 = vadd.s32 %v2847_v13, %v494_v21  ;;  %v495_v29 = vadd.s32 120, %v2839_v9  ;;  %v550_v32 = vsub.s32 0, %v2839_v9  ;;  %v512_v33 = vadd.s32 256, %v2839_v9 }
  0xb5   : > { %v496_v34 = vadd.s32 128, %v2839_v9  ;;  %v3037_v36 = vadd.s32 %v2847_v13, %v511_v28  ;;  %v1364_v45 = vpack.c.bf16 %v775_v31, %v774_v30  ;;  %v1370_v54 = vpack.c.bf16 %v779_v53, %v778_v49 }
  0xb6   : > { %v3043_v42 = vadd.s32 %v2847_v13, %v512_v33  ;;  %v3053_v48 = vrot.slane %v2866_v20, %v550_v32  ;;  %v1376_v0 = vpack.c.bf16 %v783_v63, %v782_v62  ;;  %v481_v3 = vadd.s32 8, %v2839_v9 }
  0xb7   : > { %1350 = vmatpush1.bf16.msra.mxu0 %v1349_v41  ;;  %1402 = vmatpush1.bf16.msra.mxu1 %v1349_v41  ;;  %v3040_v41 = vadd.s32 %v2847_v13, %v495_v29  ;;  %v3046_v43 = vadd.s32 %v2847_v13, %v496_v34  ;;  %v498_v4 = vadd.s32 144, %v2839_v9  ;;  %v482_v11 = vadd.s32 16, %v2839_v9 }
  0xb8   : > { %1351 = vmatprep.subr.bf16.mxu0 %v1481_v5  ;;  %1387 = vmatprep.subr.bf16.mxu1 %v1481_v5  ;;  %v515_v12 = vadd.s32 %v2847_v13, %v481_v3  ;;  %v499_v17 = vadd.s32 152, %v2839_v9  ;;  %vm556_vm0 = vcmp.eq.s32.totalorder %v2856_v18, %v3053_v48  ;;  %vm590_vm1 = vcmp.eq.s32.totalorder %v2859_v19, %v3053_v48 }
  0xb9   : > { %v532_v16 = vadd.s32 %v2847_v13, %v498_v4  ;;  %v516_v21 = vadd.s32 %v2847_v13, %v482_v11  ;;  %v500_v28 = vadd.s32 160, %v2839_v9 }
  0xba   : > { %vm559_vm14 = vcmp.eq.s32.totalorder %v515_v12, %v2869_v22  ;;  %vm558_vm2 = vcmp.eq.s32.totalorder %v515_v12, %v3053_v48 }
  0xbb   : > { %1353 = vmatpush1.bf16.msra.mxu0 %v1352_v47  ;;  %1403 = vmatpush1.bf16.msra.mxu1 %v1352_v47  ;;  %v777_v47 = vld [vmem:[%s1537_s28 + $0xb8] sm:$0xff]  ;;  %vm593_vm15 = vcmp.eq.s32.totalorder %v532_v16, %v2869_v22  ;;  %vm592_vm13 = vcmp.eq.s32.totalorder %v532_v16, %v3053_v48  ;;  %vm561_vm12 = vcmp.eq.s32.totalorder %v516_v21, %v2869_v22  ;;  %s3305_s28 = scalar_lea.vmem %s3418_s3, %s2834_s14 }
  0xbc   : > { %1354 = vmatprep.subr.bf16.mxu0 %v1481_v5  ;;  %1388 = vmatprep.subr.bf16.mxu1 %v1481_v5  ;;  %v1367_v20 = vpack.c.bf16 %v777_v47, %v776_v46  ;;  %v1034_v19 = vld [vmem:[%s3305_s28 + $0x88] sm:$0xff]  ;;  %v1037_v29 = vld [vmem:[%s3305_s28 + $0xa0] sm:$0xff]  ;;  %v1039_v53 = vld [vmem:[%s3305_s28 + $0xb0] sm:$0xff] }
  0xbd   : > { %v1022_v49 = vld [vmem:[%s3305_s28 + $0x28] sm:$0xff]  ;;  %v1024_v16 = vld [vmem:[%s3305_s28 + $0x38] sm:$0xff] }
  0xbf   : > { %1356 = vmatpush1.bf16.msra.mxu0 %v1355_v57  ;;  %1404 = vmatpush1.bf16.msra.mxu1 %v1355_v57  ;;  %v1373_v57 = vpack.c.bf16 %v781_v56, %v780_v55 }
  0xc0   : > { %1357 = vmatprep.subr.bf16.mxu0 %v1481_v5  ;;  %1389 = vmatprep.subr.bf16.mxu1 %v1481_v5 }
  0xc3   : > { %1359 = vmatpush1.bf16.msra.mxu0 %v1358_v6  ;;  %1405 = vmatpush1.bf16.msra.mxu1 %v1358_v6  ;;  %v1379_v6 = vpack.c.bf16 %v785_v2, %v784_v1  ;;  %v1040_v1 = vld [vmem:[%s3305_s28 + $0xb8] sm:$0xff] }
  0xc4   : > { %1360 = vmatprep.subr.bf16.mxu0 %v1481_v5  ;;  %1390 = vmatprep.subr.bf16.mxu1 %v1481_v5 }
  0xc7   : > { %1362 = vmatpush1.bf16.msra.mxu0 %v1361_v23  ;;  %1406 = vmatpush1.bf16.msra.mxu1 %v1361_v23  ;;  %v483_v23 = vadd.s32 24, %v2839_v9  ;;  %v534_v9 = vadd.s32 %v2847_v13, %v500_v28 }
  0xc8   : > { %1363 = vmatprep.subr.bf16.mxu0 %v1481_v5  ;;  %1391 = vmatprep.subr.bf16.mxu1 %v1481_v5 }
  0xc9   : > { %v517_v18 = vadd.s32 %v2847_v13, %v483_v23 }
  0xcb   : > { %1365 = vmatpush1.bf16.msra.mxu0 %v1364_v45  ;;  %1407 = vmatpush1.bf16.msra.mxu1 %v1364_v45 }
  0xcc   : > { %1366 = vmatprep.subr.bf16.mxu0 %v1481_v5  ;;  %1392 = vmatprep.subr.bf16.mxu1 %v1481_v5 }
  0xcf   : > { %1368 = vmatpush1.bf16.msra.mxu0 %v1367_v20  ;;  %1408 = vmatpush1.bf16.msra.mxu1 %v1367_v20 }
  0xd0   : > { %1369 = vmatprep.subr.bf16.mxu0 %v1481_v5  ;;  %1393 = vmatprep.subr.bf16.mxu1 %v1481_v5 }
  0xd3   : > { %1371 = vmatpush1.bf16.msra.mxu0 %v1370_v54  ;;  %1409 = vmatpush1.bf16.msra.mxu1 %v1370_v54 }
  0xd4   : > { %1372 = vmatprep.subr.bf16.mxu0 %v1481_v5  ;;  %1394 = vmatprep.subr.bf16.mxu1 %v1481_v5 }
  0xd7   : > { %1374 = vmatpush1.bf16.msra.mxu0 %v1373_v57  ;;  %1410 = vmatpush1.bf16.msra.mxu1 %v1373_v57 }
  0xd8   : > { %1375 = vmatprep.subr.bf16.mxu0 %v1481_v5  ;;  %1395 = vmatprep.subr.bf16.mxu1 %v1481_v5 }
  0xdb   : > { %1377 = vmatpush1.bf16.msra.mxu0 %v1376_v0  ;;  %1411 = vmatpush1.bf16.msra.mxu1 %v1376_v0  ;;  %v1023_v0 = vld [vmem:[%s3305_s28 + $0x30] sm:$0xff] }
  0xdc   : > { %1378 = vmatprep.subr.bf16.mxu0 %v1481_v5  ;;  %1396 = vmatprep.subr.bf16.mxu1 %v1481_v5  ;;  %v533_v5 = vadd.s32 %v2847_v13, %v499_v17  ;;  %v1017_v13 = vld [vmem:[%s3305_s28] sm:$0xff] }
  0xdd   : > { %v1041_v17 = vld [vmem:[%s3305_s28 + $0xc0] sm:$0xff] }
  0xde   : > { %vm595_vm11 = vcmp.eq.s32.totalorder %v533_v5, %v2869_v22 }
  0xdf   : > { %1380 = vmatpush1.bf16.msra.mxu0 %v1379_v6  ;;  %1412 = vmatpush1.bf16.msra.mxu1 %v1379_v6 }
  0xe2   : > { %1264 = vmatmul.mubr.msk.f32.vlgmr.msra.gmra.mrb[0].mxu0 %vm556_vm0, %v1482_v26  ;;  %1298 = vmatmul.mubr.msk.f32.vlgmr.msra.gmra.mrb[0].mxu1 %vm590_vm1, %v1482_v26  ;;  %vm563_vm0 = vcmp.eq.s32.totalorder %v517_v18, %v2869_v22  ;;  %vm597_vm1 = vcmp.eq.s32.totalorder %v534_v9, %v2869_v22 }
  0xe3   : > { %1265 = vmatprep.mubr.msk.f32.mxu0 %vm559_vm14, %v1482_v26  ;;  %1299 = vmatprep.mubr.msk.f32.mxu1 %vm593_vm15, %v1482_v26  ;;  %vm560_vm14 = vcmp.eq.s32.totalorder %v516_v21, %v3053_v48  ;;  %vm594_vm15 = vcmp.eq.s32.totalorder %v533_v5, %v3053_v48 }
  0xe6   : > { %1266 = vmatmul.mubr.msk.f32.gmra.mrb[2].mxu0 %vm558_vm2, %v1482_v26  ;;  %1300 = vmatmul.mubr.msk.f32.gmra.mrb[2].mxu1 %vm592_vm13, %v1482_v26  ;;  %vm562_vm13 = vcmp.eq.s32.totalorder %v517_v18, %v3053_v48  ;;  %vm598_vm2 = vcmp.eq.s32.totalorder %v2896_v37, %v3053_v48 }
  0xe7   : > { %1267 = vmatprep.mubr.msk.f32.mxu0 %vm561_vm12, %v1482_v26  ;;  %1301 = vmatprep.mubr.msk.f32.mxu1 %vm595_vm11, %v1482_v26  ;;  %vm596_vm12 = vcmp.eq.s32.totalorder %v534_v9, %v3053_v48  ;;  %vm564_vm11 = vcmp.eq.s32.totalorder %v2892_v35, %v3053_v48 }
  0xea   : > { %1268 = vmatmul.mubr.msk.f32.gmra.mrb[4].mxu0 %vm560_vm14, %v1482_v26  ;;  %1302 = vmatmul.mubr.msk.f32.gmra.mrb[4].mxu1 %vm594_vm15, %v1482_v26  ;;  %vm3419_vm14 = vcmp.eq.s32.totalorder %v2937_v52, %v2869_v22  ;;  %vm3420_vm15 = vcmp.eq.s32.totalorder %v2952_v58, %v2869_v22 }
  0xeb   : > { %1269 = vmatprep.mubr.msk.f32.mxu0 %vm563_vm0, %v1482_v26  ;;  %1303 = vmatprep.mubr.msk.f32.mxu1 %vm597_vm1, %v1482_v26  ;;  %vm3421_vm0 = vcmp.eq.s32.totalorder %v2955_v59, %v2869_v22  ;;  %vm574_vm1 = vcmp.eq.s32.totalorder %v2955_v59, %v3053_v48 }
  0xee   : > { %1270 = vmatmul.mubr.msk.f32.gmra.mrb[6].mxu0 %vm562_vm13, %v1482_v26  ;;  %1304 = vmatmul.mubr.msk.f32.gmra.mrb[6].mxu1 %vm596_vm12, %v1482_v26  ;;  %vm3422_vm13 = vcmp.eq.s32.totalorder %v2958_v60, %v2869_v22  ;;  %vm608_vm12 = vcmp.eq.s32.totalorder %v2958_v60, %v3053_v48 }
  0xef   : > { %1271 = vmatprep.mubr.msk.f32.mxu0 %vm565_vm3, %v1482_v26  ;;  %1305 = vmatprep.mubr.msk.f32.mxu1 %vm599_vm4, %v1482_v26  ;;  %vm566_vm3 = vcmp.eq.s32.totalorder %v2899_v38, %v3053_v48  ;;  %vm600_vm4 = vcmp.eq.s32.totalorder %v2902_v39, %v3053_v48 }
  0xf2   : > { %1272 = vmatmul.mubr.msk.f32.gmra.mrb[8].mxu0 %vm564_vm11, %v1482_v26  ;;  %1306 = vmatmul.mubr.msk.f32.gmra.mrb[8].mxu1 %vm598_vm2, %v1482_v26  ;;  %vm3423_vm11 = vcmp.eq.s32.totalorder %v2961_v61, %v2869_v22  ;;  %vm576_vm2 = vcmp.eq.s32.totalorder %v2961_v61, %v3053_v48  ;;  %v1019_v61 = vld [vmem:[%s3305_s28 + $0x10] sm:$0xff] }
  0xf3   : > { %1273 = vmatprep.mubr.msk.f32.mxu0 %vm567_vm5, %v1482_v26  ;;  %1307 = vmatprep.mubr.msk.f32.mxu1 %vm601_vm6, %v1482_v26  ;;  %vm568_vm5 = vcmp.eq.s32.totalorder %v2905_v40, %v3053_v48  ;;  %vm602_vm6 = vcmp.eq.s32.totalorder %v2912_v44, %v3053_v48  ;;  %v1018_v40 = vld [vmem:[%s3305_s28 + $0x8] sm:$0xff]  ;;  %v1035_v44 = vld [vmem:[%s3305_s28 + $0x90] sm:$0xff] }
  0xf6   : > { %1274 = vmatmul.mubr.msk.f32.gmra.mrb[10].mxu0 %vm566_vm3, %v1482_v26  ;;  %1308 = vmatmul.mubr.msk.f32.gmra.mrb[10].mxu1 %vm600_vm4, %v1482_v26  ;;  %vm3424_vm3 = vcmp.eq.s32.totalorder %v2981_v7, %v2869_v22  ;;  %vm610_vm4 = vcmp.eq.s32.totalorder %v2981_v7, %v3053_v48  ;;  %v1036_v7 = vld [vmem:[%s3305_s28 + $0x98] sm:$0xff] }
  0xf7   : > { %1275 = vmatprep.mubr.msk.f32.mxu0 %vm569_vm7, %v1482_v26  ;;  %1309 = vmatprep.mubr.msk.f32.mxu1 %vm603_vm8, %v1482_v26  ;;  %vm570_vm7 = vcmp.eq.s32.totalorder %v2931_v50, %v3053_v48  ;;  %vm604_vm8 = vcmp.eq.s32.totalorder %v2934_v51, %v3053_v48 }
  0xfa   : > { %1276 = vmatmul.mubr.msk.f32.gmra.mrb[12].mxu0 %vm568_vm5, %v1482_v26  ;;  %1310 = vmatmul.mubr.msk.f32.gmra.mrb[12].mxu1 %vm602_vm6, %v1482_v26  ;;  %vm3425_vm5 = vcmp.eq.s32.totalorder %v2984_v8, %v2869_v22  ;;  %vm578_vm6 = vcmp.eq.s32.totalorder %v2984_v8, %v3053_v48 }
  0xfb   : > { %1277 = vmatprep.mubr.msk.f32.mxu0 %vm571_vm9, %v1482_v26  ;;  %1311 = vmatprep.mubr.msk.f32.mxu1 %vm605_vm10, %v1482_v26  ;;  %vm572_vm9 = vcmp.eq.s32.totalorder %v2937_v52, %v3053_v48  ;;  %vm606_vm10 = vcmp.eq.s32.totalorder %v2952_v58, %v3053_v48 }
  0xfe   : > { %1278 = vmatmul.mubr.msk.f32.gmra.mrb[14].mxu0 %vm570_vm7, %v1482_v26  ;;  %1312 = vmatmul.mubr.msk.f32.gmra.mrb[14].mxu1 %vm604_vm8, %v1482_v26  ;;  %vm3426_vm7 = vcmp.eq.s32.totalorder %v2987_v10, %v2869_v22  ;;  %vm612_vm8 = vcmp.eq.s32.totalorder %v2987_v10, %v3053_v48 }
  0xff   : > { %1279 = vmatprep.mubr.msk.f32.mxu0 %vm3419_vm14, %v1482_v26  ;;  %1313 = vmatprep.mubr.msk.f32.mxu1 %vm3420_vm15, %v1482_v26  ;;  %vm3427_vm14 = vcmp.eq.s32.totalorder %v2992_v14, %v2869_v22  ;;  %vm3428_vm15 = vcmp.eq.s32.totalorder %v2995_v15, %v2869_v22 }
 0x102   : > { %1280 = vmatmul.mubr.msk.f32.gmra.mrb[16].mxu0 %vm572_vm9, %v1482_v26  ;;  %1314 = vmatmul.mubr.msk.f32.gmra.mrb[16].mxu1 %vm606_vm10, %v1482_v26  ;;  %vm580_vm9 = vcmp.eq.s32.totalorder %v2992_v14, %v3053_v48  ;;  %vm614_vm10 = vcmp.eq.s32.totalorder %v2995_v15, %v3053_v48 }
 0x103   : > { %1281 = vmatprep.mubr.msk.f32.mxu0 %vm3421_vm0, %v1482_v26  ;;  %1315 = vmatprep.mubr.msk.f32.mxu1 %vm3422_vm13, %v1482_v26  ;;  %vm3429_vm0 = vcmp.eq.s32.totalorder %v3013_v24, %v2869_v22  ;;  %vm3430_vm13 = vcmp.eq.s32.totalorder %v3016_v25, %v2869_v22 }
 0x106   : > { %1282 = vmatmul.mubr.msk.f32.gmra.mrb[18].mxu0 %vm574_vm1, %v1482_v26  ;;  %1316 = vmatmul.mubr.msk.f32.gmra.mrb[18].mxu1 %vm608_vm12, %v1482_v26  ;;  %vm582_vm1 = vcmp.eq.s32.totalorder %v3013_v24, %v3053_v48  ;;  %vm616_vm12 = vcmp.eq.s32.totalorder %v3016_v25, %v3053_v48 }
 0x107   : > { %1283 = vmatprep.mubr.msk.f32.mxu0 %vm3423_vm11, %v1482_v26  ;;  %1317 = vmatprep.mubr.msk.f32.mxu1 %vm3424_vm3, %v1482_v26  ;;  %vm3431_vm11 = vcmp.eq.s32.totalorder %v3019_v27, %v2869_v22  ;;  %vm3432_vm3 = vcmp.eq.s32.totalorder %v3037_v36, %v2869_v22 }
 0x10a   : > { %1284 = vmatmul.mubr.msk.f32.gmra.mrb[20].mxu0 %vm576_vm2, %v1482_v26  ;;  %1318 = vmatmul.mubr.msk.f32.gmra.mrb[20].mxu1 %vm610_vm4, %v1482_v26  ;;  %vm584_vm2 = vcmp.eq.s32.totalorder %v3019_v27, %v3053_v48  ;;  %vm618_vm4 = vcmp.eq.s32.totalorder %v3037_v36, %v3053_v48  ;;  %v1020_v27 = vld [vmem:[%s3305_s28 + $0x18] sm:$0xff] }
 0x10b   : > { %1285 = vmatprep.mubr.msk.f32.mxu0 %vm3425_vm5, %v1482_v26  ;;  %1319 = vmatprep.mubr.msk.f32.mxu1 %vm3426_vm7, %v1482_v26  ;;  %vm3433_vm5 = vcmp.eq.s32.totalorder %v3040_v41, %v2869_v22  ;;  %vm3434_vm7 = vcmp.eq.s32.totalorder %v3043_v42, %v2869_v22 }
 0x10e   : > { %1286 = vmatmul.mubr.msk.f32.gmra.mrb[22].mxu0 %vm578_vm6, %v1482_v26  ;;  %1320 = vmatmul.mubr.msk.f32.gmra.mrb[22].mxu1 %vm612_vm8, %v1482_v26  ;;  %vm586_vm6 = vcmp.eq.s32.totalorder %v3040_v41, %v3053_v48  ;;  %vm620_vm8 = vcmp.eq.s32.totalorder %v3043_v42, %v3053_v48  ;;  %v1021_v41 = vld [vmem:[%s3305_s28 + $0x20] sm:$0xff]  ;;  %v1038_v42 = vld [vmem:[%s3305_s28 + $0xa8] sm:$0xff] }
 0x10f   : > { %1287 = vmatprep.mubr.msk.f32.mxu0 %vm3427_vm14, %v1482_v26  ;;  %1321 = vmatprep.mubr.msk.f32.mxu1 %vm3428_vm15, %v1482_v26  ;;  %vm3435_vm14 = vcmp.eq.s32.totalorder %v3046_v43, %v2869_v22  ;;  %vm1083_vm15 = vcmask 31744  }
 0x112   : > { %1288 = vmatmul.mubr.msk.f32.gmra.mrb[24].mxu0 %vm580_vm9, %v1482_v26  ;;  %1322 = vmatmul.mubr.msk.f32.gmra.mrb[24].mxu1 %vm614_vm10, %v1482_v26  ;;  %vm3436_vm9 = vcmp.eq.s32.totalorder %v3046_v43, %v3053_v48 }
 0x113   : > { %1289 = vmatprep.mubr.msk.f32.mxu0 %vm3429_vm0, %v1482_v26  ;;  %1323 = vmatprep.mubr.msk.f32.mxu1 %vm3430_vm13, %v1482_v26 }
 0x116   : > { %1290 = vmatmul.mubr.msk.f32.gmra.mrb[26].mxu0 %vm582_vm1, %v1482_v26  ;;  %1324 = vmatmul.mubr.msk.f32.gmra.mrb[26].mxu1 %vm616_vm12, %v1482_v26 }
 0x117   : > { %1291 = vmatprep.mubr.msk.f32.mxu0 %vm3431_vm11, %v1482_v26  ;;  %1325 = vmatprep.mubr.msk.f32.mxu1 %vm3432_vm3, %v1482_v26 }
 0x11a   : > { %1292 = vmatmul.mubr.msk.f32.gmra.mrb[28].mxu0 %vm584_vm2, %v1482_v26  ;;  %1326 = vmatmul.mubr.msk.f32.gmra.mrb[28].mxu1 %vm618_vm4, %v1482_v26 }
 0x11b   : > { %1293 = vmatprep.mubr.msk.f32.mxu0 %vm3433_vm5, %v1482_v26  ;;  %1327 = vmatprep.mubr.msk.f32.mxu1 %vm3434_vm7, %v1482_v26 }
 0x11e   : > { %1294 = vmatmul.mubr.msk.f32.gmra.mrb[30].mxu0 %vm586_vm6, %v1482_v26  ;;  %1328 = vmatmul.mubr.msk.f32.gmra.mrb[30].mxu1 %vm620_vm8, %v1482_v26 }
 0x11f   : > { %1295 = vmatprep.mubr.msk.f32.mxu0 %vm3435_vm14, %v1482_v26 }
 0x122   : > { %1296 = vmatmul.mubr.msk.f32.gmra.mrb[32].mxu0 %vm3436_vm9, %v1482_v26 }
 0x1b5   : > { %v852_v22 = vpop.f32.mrb[0].mxu0  ;;  %v937_v35 = vpop.f32.mrb[0].mxu1 }
 0x1b6   : > { %v1050_v37 = vadd.f32 %v1017_v13, %v852_v22  ;;  %v854_v26 = vpop.f32.mrb[1].mxu0  ;;  %v1067_v38 = vadd.f32 %v1034_v19, %v937_v35  ;;  %v939_v39 = vpop.f32.mrb[1].mxu1  ;;  %v1025_v13 = vld [vmem:[%s3305_s28 + $0x40] sm:$0xff]  ;;  %v1042_v19 = vld [vmem:[%s3305_s28 + $0xc8] sm:$0xff] }
 0x1b8   : > { %1084 = vst.msk [vmem:[%s3305_s28] sm:$0xff] %vm1083_vm15, %v1050_v37  ;;  %1101 = vst.msk [vmem:[%s3305_s28 + $0x88] sm:$0xff] %vm1083_vm15, %v1067_v38 }
 0x1b9   : > { %v857_v50 = vpop.f32.mrb[2].mxu0  ;;  %v942_v51 = vpop.f32.mrb[2].mxu1 }
 0x1ba   : > { %v1051_v52 = vadd.f32 %v1018_v40, %v857_v50  ;;  %v859_v58 = vpop.f32.mrb[3].mxu0  ;;  %v1068_v59 = vadd.f32 %v1035_v44, %v942_v51  ;;  %v944_v60 = vpop.f32.mrb[3].mxu1  ;;  %v1026_v40 = vld [vmem:[%s3305_s28 + $0x48] sm:$0xff]  ;;  %v1043_v44 = vld [vmem:[%s3305_s28 + $0xd0] sm:$0xff] }
 0x1bc   : > { %1085 = vst.msk [vmem:[%s3305_s28 + $0x8] sm:$0xff] %vm1083_vm15, %v1051_v52  ;;  %1102 = vst.msk [vmem:[%s3305_s28 + $0x90] sm:$0xff] %vm1083_vm15, %v1068_v59 }
 0x1bd   : > { %v862_v8 = vpop.f32.mrb[4].mxu0  ;;  %v947_v10 = vpop.f32.mrb[4].mxu1 }
 0x1be   : > { %v1052_v14 = vadd.f32 %v1019_v61, %v862_v8  ;;  %v864_v15 = vpop.f32.mrb[5].mxu0  ;;  %v1069_v24 = vadd.f32 %v1036_v7, %v947_v10  ;;  %v949_v25 = vpop.f32.mrb[5].mxu1  ;;  %v1027_v61 = vld [vmem:[%s3305_s28 + $0x50] sm:$0xff]  ;;  %v1044_v7 = vld [vmem:[%s3305_s28 + $0xd8] sm:$0xff] }
 0x1c0   : > { %1086 = vst.msk [vmem:[%s3305_s28 + $0x10] sm:$0xff] %vm1083_vm15, %v1052_v14  ;;  %1103 = vst.msk [vmem:[%s3305_s28 + $0x98] sm:$0xff] %vm1083_vm15, %v1069_v24 }
 0x1c1   : > { %v867_v30 = vpop.f32.mrb[6].mxu0  ;;  %v952_v31 = vpop.f32.mrb[6].mxu1 }
 0x1c2   : > { %v1053_v32 = vadd.f32 %v1020_v27, %v867_v30  ;;  %v869_v33 = vpop.f32.mrb[7].mxu0  ;;  %v1070_v34 = vadd.f32 %v1037_v29, %v952_v31  ;;  %v954_v36 = vpop.f32.mrb[7].mxu1  ;;  %v1028_v27 = vld [vmem:[%s3305_s28 + $0x58] sm:$0xff]  ;;  %v1045_v29 = vld [vmem:[%s3305_s28 + $0xe0] sm:$0xff] }
 0x1c4   : > { %1087 = vst.msk [vmem:[%s3305_s28 + $0x18] sm:$0xff] %vm1083_vm15, %v1053_v32  ;;  %1104 = vst.msk [vmem:[%s3305_s28 + $0xa0] sm:$0xff] %vm1083_vm15, %v1070_v34 }
 0x1c5   : > { %v872_v43 = vpop.f32.mrb[8].mxu0  ;;  %v957_v45 = vpop.f32.mrb[8].mxu1 }
 0x1c6   : > { %v1054_v46 = vadd.f32 %v1021_v41, %v872_v43  ;;  %v874_v47 = vpop.f32.mrb[9].mxu0  ;;  %v1071_v48 = vadd.f32 %v1038_v42, %v957_v45  ;;  %v959_v20 = vpop.f32.mrb[9].mxu1  ;;  %v1029_v41 = vld [vmem:[%s3305_s28 + $0x60] sm:$0xff]  ;;  %v1046_v42 = vld [vmem:[%s3305_s28 + $0xe8] sm:$0xff] }
 0x1c8   : > { %1088 = vst.msk [vmem:[%s3305_s28 + $0x20] sm:$0xff] %vm1083_vm15, %v1054_v46  ;;  %1105 = vst.msk [vmem:[%s3305_s28 + $0xa8] sm:$0xff] %vm1083_vm15, %v1071_v48 }
 0x1c9   : > { %v877_v54 = vpop.f32.mrb[10].mxu0  ;;  %v962_v55 = vpop.f32.mrb[10].mxu1 }
 0x1ca   : > { %v1055_v56 = vadd.f32 %v1022_v49, %v877_v54  ;;  %v879_v57 = vpop.f32.mrb[11].mxu0  ;;  %v1072_v62 = vadd.f32 %v1039_v53, %v962_v55  ;;  %v964_v63 = vpop.f32.mrb[11].mxu1  ;;  %v1030_v49 = vld [vmem:[%s3305_s28 + $0x68] sm:$0xff]  ;;  %v1047_v53 = vld [vmem:[%s3305_s28 + $0xf0] sm:$0xff] }
 0x1cc   : > { %1089 = vst.msk [vmem:[%s3305_s28 + $0x28] sm:$0xff] %vm1083_vm15, %v1055_v56  ;;  %1106 = vst.msk [vmem:[%s3305_s28 + $0xb0] sm:$0xff] %vm1083_vm15, %v1072_v62 }
 0x1cd   : > { %v882_v2 = vpop.f32.mrb[12].mxu0  ;;  %v967_v3 = vpop.f32.mrb[12].mxu1 }
 0x1ce   : > { %v1056_v4 = vadd.f32 %v1023_v0, %v882_v2  ;;  %v884_v6 = vpop.f32.mrb[13].mxu0  ;;  %v1073_v11 = vadd.f32 %v1040_v1, %v967_v3  ;;  %v969_v12 = vpop.f32.mrb[13].mxu1  ;;  %v1031_v0 = vld [vmem:[%s3305_s28 + $0x70] sm:$0xff]  ;;  %v1048_v1 = vld [vmem:[%s3305_s28 + $0xf8] sm:$0xff] }
 0x1d0   : > { %1090 = vst.msk [vmem:[%s3305_s28 + $0x30] sm:$0xff] %vm1083_vm15, %v1056_v4  ;;  %1107 = vst.msk [vmem:[%s3305_s28 + $0xb8] sm:$0xff] %vm1083_vm15, %v1073_v11 }
 0x1d1   : > { %v887_v21 = vpop.f32.mrb[14].mxu0  ;;  %v972_v23 = vpop.f32.mrb[14].mxu1 }
 0x1d2   : > { %v1057_v5 = vadd.f32 %v1024_v16, %v887_v21  ;;  %v889_v28 = vpop.f32.mrb[15].mxu0  ;;  %v1074_v18 = vadd.f32 %v1041_v17, %v972_v23  ;;  %v974_v9 = vpop.f32.mrb[15].mxu1  ;;  %v1032_v16 = vld [vmem:[%s3305_s28 + $0x78] sm:$0xff]  ;;  %v1049_v17 = vld [vmem:[%s3305_s28 + $0x100] sm:$0xff] }
 0x1d4   : > { %1091 = vst.msk [vmem:[%s3305_s28 + $0x38] sm:$0xff] %vm1083_vm15, %v1057_v5  ;;  %1108 = vst.msk [vmem:[%s3305_s28 + $0xc0] sm:$0xff] %vm1083_vm15, %v1074_v18 }
 0x1d5   : > { %v892_v22 = vpop.f32.mrb[16].mxu0  ;;  %v977_v35 = vpop.f32.mrb[16].mxu1 }
 0x1d6   : > { %v1058_v37 = vadd.f32 %v1025_v13, %v892_v22  ;;  %v894_v26 = vpop.f32.mrb[17].mxu0  ;;  %v1075_v38 = vadd.f32 %v1042_v19, %v977_v35  ;;  %v979_v39 = vpop.f32.mrb[17].mxu1  ;;  %v1033_v13 = vld [vmem:[%s3305_s28 + $0x80] sm:$0xff] }
 0x1d8   : > { %1092 = vst.msk [vmem:[%s3305_s28 + $0x40] sm:$0xff] %vm1083_vm15, %v1058_v37  ;;  %1109 = vst.msk [vmem:[%s3305_s28 + $0xc8] sm:$0xff] %vm1083_vm15, %v1075_v38 }
 0x1d9   : > { %v897_v50 = vpop.f32.mrb[18].mxu0  ;;  %v982_v51 = vpop.f32.mrb[18].mxu1 }
 0x1da   : > { %v1059_v52 = vadd.f32 %v1026_v40, %v897_v50  ;;  %v899_v58 = vpop.f32.mrb[19].mxu0  ;;  %v1076_v59 = vadd.f32 %v1043_v44, %v982_v51  ;;  %v984_v60 = vpop.f32.mrb[19].mxu1 }
 0x1dc   : > { %1093 = vst.msk [vmem:[%s3305_s28 + $0x48] sm:$0xff] %vm1083_vm15, %v1059_v52  ;;  %1110 = vst.msk [vmem:[%s3305_s28 + $0xd0] sm:$0xff] %vm1083_vm15, %v1076_v59 }
 0x1dd   : > { %v902_v8 = vpop.f32.mrb[20].mxu0  ;;  %v987_v10 = vpop.f32.mrb[20].mxu1 }
 0x1de   : > { %v1060_v14 = vadd.f32 %v1027_v61, %v902_v8  ;;  %v904_v15 = vpop.f32.mrb[21].mxu0  ;;  %v1077_v24 = vadd.f32 %v1044_v7, %v987_v10  ;;  %v989_v25 = vpop.f32.mrb[21].mxu1 }
 0x1e0   : > { %1094 = vst.msk [vmem:[%s3305_s28 + $0x50] sm:$0xff] %vm1083_vm15, %v1060_v14  ;;  %1111 = vst.msk [vmem:[%s3305_s28 + $0xd8] sm:$0xff] %vm1083_vm15, %v1077_v24 }
 0x1e1   : > { %v907_v30 = vpop.f32.mrb[22].mxu0  ;;  %v992_v31 = vpop.f32.mrb[22].mxu1 }
 0x1e2   : > { %v1061_v32 = vadd.f32 %v1028_v27, %v907_v30  ;;  %v909_v33 = vpop.f32.mrb[23].mxu0  ;;  %v1078_v34 = vadd.f32 %v1045_v29, %v992_v31  ;;  %v994_v36 = vpop.f32.mrb[23].mxu1 }
 0x1e4   : > { %1095 = vst.msk [vmem:[%s3305_s28 + $0x58] sm:$0xff] %vm1083_vm15, %v1061_v32  ;;  %1112 = vst.msk [vmem:[%s3305_s28 + $0xe0] sm:$0xff] %vm1083_vm15, %v1078_v34 }
 0x1e5   : > { %v912_v43 = vpop.f32.mrb[24].mxu0  ;;  %v997_v45 = vpop.f32.mrb[24].mxu1 }
 0x1e6   : > { %v1062_v46 = vadd.f32 %v1029_v41, %v912_v43  ;;  %v914_v47 = vpop.f32.mrb[25].mxu0  ;;  %v1079_v48 = vadd.f32 %v1046_v42, %v997_v45  ;;  %v999_v20 = vpop.f32.mrb[25].mxu1 }
 0x1e8   : > { %1096 = vst.msk [vmem:[%s3305_s28 + $0x60] sm:$0xff] %vm1083_vm15, %v1062_v46  ;;  %1113 = vst.msk [vmem:[%s3305_s28 + $0xe8] sm:$0xff] %vm1083_vm15, %v1079_v48 }
 0x1e9   : > { %v917_v54 = vpop.f32.mrb[26].mxu0  ;;  %v1002_v55 = vpop.f32.mrb[26].mxu1 }
 0x1ea   : > { %v1063_v56 = vadd.f32 %v1030_v49, %v917_v54  ;;  %v919_v57 = vpop.f32.mrb[27].mxu0  ;;  %v1080_v62 = vadd.f32 %v1047_v53, %v1002_v55  ;;  %v1004_v63 = vpop.f32.mrb[27].mxu1 }
 0x1ec   : > { %1097 = vst.msk [vmem:[%s3305_s28 + $0x68] sm:$0xff] %vm1083_vm15, %v1063_v56  ;;  %1114 = vst.msk [vmem:[%s3305_s28 + $0xf0] sm:$0xff] %vm1083_vm15, %v1080_v62 }
 0x1ed   : > { %v922_v2 = vpop.f32.mrb[28].mxu0  ;;  %v1007_v3 = vpop.f32.mrb[28].mxu1 }
 0x1ee   : > { %v1064_v4 = vadd.f32 %v1031_v0, %v922_v2  ;;  %v924_v6 = vpop.f32.mrb[29].mxu0  ;;  %v1081_v11 = vadd.f32 %v1048_v1, %v1007_v3  ;;  %v1009_v12 = vpop.f32.mrb[29].mxu1 }
 0x1f0   : > { %1098 = vst.msk [vmem:[%s3305_s28 + $0x70] sm:$0xff] %vm1083_vm15, %v1064_v4  ;;  %1115 = vst.msk [vmem:[%s3305_s28 + $0xf8] sm:$0xff] %vm1083_vm15, %v1081_v11 }
 0x1f1   : > { %v927_v21 = vpop.f32.mrb[30].mxu0  ;;  %v1012_v23 = vpop.f32.mrb[30].mxu1 }
 0x1f2   : > { %v1065_v5 = vadd.f32 %v1032_v16, %v927_v21  ;;  %v929_v28 = vpop.f32.mrb[31].mxu0  ;;  %v1082_v18 = vadd.f32 %v1049_v17, %v1012_v23  ;;  %v1014_v9 = vpop.f32.mrb[31].mxu1 }
 0x1f4   : > { %1099 = vst.msk [vmem:[%s3305_s28 + $0x78] sm:$0xff] %vm1083_vm15, %v1065_v5  ;;  %1116 = vst.msk [vmem:[%s3305_s28 + $0x100] sm:$0xff] %vm1083_vm15, %v1082_v18 }
 0x1f5   : > { %v932_v19 = vpop.f32.mrb[32].mxu0 }
 0x1f6   : > { %v1066_v22 = vadd.f32 %v1033_v13, %v932_v19  ;;  %v934_v35 = vpop.f32.mrb[33].mxu0 }
 0x1f8   : > { %1100 = vst.msk [vmem:[%s3305_s28 + $0x80] sm:$0xff] %vm1083_vm15, %v1066_v22 }
 0x1f9 PF: > { %s19_s19 = sadd.s32 1, %s1477_s19   ;;  %s3437_s17 = smov %s1473_s18 }
 0x1fa   : > { %p16_p12 = scmp.ge.s32.totalorder %s19_s19, 10   ;;  %s3438_s18 = smov %s3440_s0 }
 0x1fc   :  { %18 = sbr.rel (!%p16_p12) target bundleno = 17 (0x11), region = 66 }

</bundles_post_ra>
